<compile_context>
chip_gen: v6e
topology: v6e:2x2x1
jax: 0.10.0
libtpu: 0.0.40
codegen_flags: <defaults>
</compile_context>

<pallas_src>
import jax
import jax.numpy as jnp
from jax import lax
from jax.experimental import pallas as pl
from jax.experimental.pallas import tpu as pltpu


def _round_up(n, m):
    return (n + m - 1) // m * m


def _make_kernel(T, L, mm_dtype):
    """Build the fused BiLSTM kernel with static T (seq len), L (labels)."""

    def kernel(x_ref, wihf_ref, bf_ref, wihb_ref, bb_ref, whh_ref,
               wof_ref, wob_ref, bo_ref, out_ref, xg_ref):
        # x_ref    : (T*Bp, E)     embedded tokens, time-major, batch padded
        # wihf_ref : (E, 4*Hp)     forward input weights, pre-transposed (K,N)
        # bf_ref   : (1, 4*Hp)     forward combined bias (b_ih + b_hh)
        # wihb_ref : (E, 4*Hp)     backward input weights, pre-transposed (K,N)
        # bb_ref   : (1, 4*Hp)     backward combined bias
        # whh_ref  : (Hp, 4*Hp)    forward recurrent weights, pre-transposed
        # wof_ref  : (Hp, Lp)      output projection (forward half), (K,N)
        # wob_ref  : (Hp, Lp)      output projection (backward half), (K,N)
        # bo_ref   : (1, Lp)
        # out_ref  : (Bp, Lp)      log-probs (padded lanes are garbage)
        # xg_ref   : (T*Bp, 4*Hp)  VMEM scratch: hoisted FORWARD input proj
        TB, _E = x_ref.shape
        Bp = TB // T
        Hp = whh_ref.shape[0]

        # (1) Forward-direction input projection for every timestep in a
        #     single MXU call; bias folded in (broadcast happens exactly once).
        xg_ref[...] = (
            jnp.dot(x_ref[...], wihf_ref[...],
                    preferred_element_type=jnp.float32)
            + bf_ref[...])                                   # (T*Bp, 4*Hp)

        whh = whh_ref[...]                                   # (Hp, 4*Hp) (K,N)

        def gates_to_hc(g, c):
            # Hp is a multiple of 128, so every gate slice is a whole lane
            # tile -> no cross-lane relayout on the recurrence critical path.
            # Gate math stays in f32 (v5e has no bf16 VPU/EUP).
            i = jax.nn.sigmoid(g[:, 0 * Hp:1 * Hp])
            f = jax.nn.sigmoid(g[:, 1 * Hp:2 * Hp])
            u = jnp.tanh(g[:, 2 * Hp:3 * Hp])
            o = jax.nn.sigmoid(g[:, 3 * Hp:4 * Hp])
            c_new = f * c + i * u
            return o * jnp.tanh(c_new), c_new

        h = jnp.zeros((Bp, Hp), jnp.float32)
        c = jnp.zeros((Bp, Hp), jnp.float32)

        # (2) Forward recurrence, statically unrolled (T small & fixed): the
        #     serial per-step work is one (Bp,Hp)x(Hp,4Hp) matmul + gate math.
        for t in range(T):
            g = xg_ref[t * Bp:(t + 1) * Bp, :] + jnp.dot(
                h.astype(mm_dtype), whh, preferred_element_type=jnp.float32)
            h, c = gates_to_hc(g, c)

        # (3) Backward direction: lstm_out[-1] only consumes the backward state
        #     at t = T-1, i.e. one step from the zero initial state, so the
        #     recurrent term h0 @ Whh_b is identically zero.  Only a single
        #     (Bp,E)x(E,4*Hp) input projection on x[T-1] is needed.
        gb = (jnp.dot(x_ref[(T - 1) * Bp:T * Bp, :], wihb_ref[...],
                      preferred_element_type=jnp.float32)
              + bb_ref[...])
        hb, _ = gates_to_hc(gb, jnp.zeros((Bp, Hp), jnp.float32))

        # (4) Output projection as two (Bp,Hp)x(Hp,Lp) matmuls -- no lane
        #     concat of (h, hb), so no cross-lane relayout on the kernel tail.
        y = (jnp.dot(h.astype(mm_dtype), wof_ref[...],
                     preferred_element_type=jnp.float32)
             + jnp.dot(hb.astype(mm_dtype), wob_ref[...],
                       preferred_element_type=jnp.float32)
             + bo_ref[...])                                  # (Bp, Lp)

        # (5) log_softmax over the real L labels only; padded lanes masked so
        #     the (Bp, Lp) store stays a full lane-dense unmasked vst.
        lane = lax.broadcasted_iota(jnp.int32, y.shape, 1)
        y = jnp.where(lane < L, y, jnp.float32(-1e30))
        m = jnp.max(y, axis=1, keepdims=True)
        z = y - m
        lse = jnp.log(jnp.sum(jnp.exp(z), axis=1, keepdims=True))
        out_ref[...] = z - lse

    return kernel


def prepare_params(params, matmul_dtype=jnp.bfloat16):
    """Pad to TPU tile sizes and pre-transpose weights to (K, N) layout.

    PyTorch layouts in `params`:
      wih_*: (4H, E)   whh_*: (4H, H)   b_*: (1, 4H)   wo: (L, 2H)   bo: (1, L)
    Prepared (Hp = H rounded to 128, Lp = L rounded to 128):
      wih_f/wih_b: (E, 4*Hp)   b_f/b_b: (1, 4*Hp)   whh_f: (Hp, 4*Hp)
      wo_f/wo_b: (Hp, Lp)      bo: (1, Lp)
    whh_b is intentionally dropped (see kernel step (3)).
    bf16 matmul operands are the recommended fast path on v5e/v6e/v7x (all
    MXUs are bf16-native); f32 operands are only for exact validation.
    """
    H = params["whh_f"].shape[1]
    E = params["wih_f"].shape[1]
    L = params["wo"].shape[0]
    Hp = _round_up(H, 128)
    Lp = _round_up(L, 128)

    def pad_gates_T(w, in_dim, in_pad):
        # (4H, in_dim) -> (in_pad, 4*Hp): pad each gate's H block and the K dim.
        w4 = w.reshape(4, H, in_dim)
        w4 = jnp.pad(w4, ((0, 0), (0, Hp - H), (0, in_pad - in_dim)))
        return w4.reshape(4 * Hp, in_pad).T

    def pad_gates_b(b):
        b4 = b.reshape(4, H)
        b4 = jnp.pad(b4, ((0, 0), (0, Hp - H)))
        return b4.reshape(1, 4 * Hp)

    wo = params["wo"]                                   # (L, 2H): [fwd | bwd]
    wo_f = jnp.pad(wo[:, :H], ((0, Lp - L), (0, Hp - H))).T   # (Hp, Lp)
    wo_b = jnp.pad(wo[:, H:], ((0, Lp - L), (0, Hp - H))).T   # (Hp, Lp)

    return dict(
        embedding=params["embedding"],
        wih_f=pad_gates_T(params["wih_f"], E, E).astype(matmul_dtype),
        wih_b=pad_gates_T(params["wih_b"], E, E).astype(matmul_dtype),
        whh_f=pad_gates_T(params["whh_f"], H, Hp).astype(matmul_dtype),
        b_f=pad_gates_b(params["b_f"]).astype(jnp.float32),
        b_b=pad_gates_b(params["b_b"]).astype(jnp.float32),
        wo_f=wo_f.astype(matmul_dtype),
        wo_b=wo_b.astype(matmul_dtype),
        bo=jnp.pad(params["bo"], ((0, 0), (0, Lp - L))).astype(jnp.float32),
        H=H, L=L, Hp=Hp, Lp=Lp, matmul_dtype=matmul_dtype,
    )


def bilstm_sentiment_forward(sentence, prep):
    T, B = sentence.shape
    E = prep["embedding"].shape[1]
    Hp, Lp, L = prep["Hp"], prep["Lp"], prep["L"]
    mm_dtype = prep["matmul_dtype"]
    # bf16 packs 16 rows per sublane group: pad the batch so matmul LHS vregs
    # are fully occupied (costs nothing at small B); f32 keeps the 8-row tile.
    sublane = 16 if mm_dtype == jnp.bfloat16 else 8
    Bp = _round_up(B, sublane)

    # Embedding gather is glue (data-dependent row gather) -> plain JAX.
    # TODO(synk): fuse via scalar-prefetched token ids + in-kernel DMA row
    # gather so the (T,Bp,E) embedded input is never materialized in HBM.
    x = jnp.take(prep["embedding"], sentence, axis=0)        # (T, B, E)
    x = jnp.pad(x, ((0, 0), (0, Bp - B), (0, 0)))            # pad to sublane tile
    x2 = x.reshape(T * Bp, E).astype(mm_dtype)               # time-major flatten

    kernel = _make_kernel(T=T, L=L, mm_dtype=mm_dtype)

    def full_spec(shape):
        nd = len(shape)
        return pl.BlockSpec(shape, lambda i, _nd=nd: (0,) * _nd)

    args = (x2, prep["wih_f"], prep["b_f"], prep["wih_b"], prep["b_b"],
            prep["whh_f"], prep["wo_f"], prep["wo_b"], prep["bo"])

    out = pl.pallas_call(
        kernel,
        out_shape=jax.ShapeDtypeStruct((Bp, Lp), jnp.float32),
        grid=(1,),
        in_specs=[full_spec(a.shape) for a in args],
        out_specs=full_spec((Bp, Lp)),
        scratch_shapes=[pltpu.VMEM((T * Bp, 4 * Hp), jnp.float32)],
        compiler_params=pltpu.CompilerParams(
            dimension_semantics=("arbitrary",)),
    )(*args)
    return out[:B, :L]


def init_params(key, vocab_size, embedding_dim, hidden_dim, label_size):
    ks = jax.random.split(key, 12)
    s = 1.0 / float(hidden_dim) ** 0.5

    def u(k, shape):
        return jax.random.uniform(k, shape, jnp.float32, -s, s)

    H, E, L = hidden_dim, embedding_dim, label_size
    return dict(
        embedding=jax.random.normal(ks[0], (vocab_size, E), jnp.float32),
        wih_f=u(ks[1], (4 * H, E)),
        whh_f=u(ks[2], (4 * H, H)),
        b_f=u(ks[3], (1, 4 * H)) + u(ks[4], (1, 4 * H)),   # b_ih + b_hh combined
        wih_b=u(ks[5], (4 * H, E)),
        whh_b=u(ks[6], (4 * H, H)),
        b_b=u(ks[7], (1, 4 * H)) + u(ks[8], (1, 4 * H)),
        wo=u(ks[9], (L, 2 * H)),
        bo=u(ks[10], (1, L)),
    )


def reference_forward(sentence, p):
    """Pure-JAX reference: full bidirectional LSTM, then lstm_out[-1]."""
    x = jnp.take(p["embedding"], sentence, axis=0)
    T, B, E = x.shape
    H = p["whh_f"].shape[1]

    def step(carry, x_t, wih, whh, b):
        h, c = carry
        g = x_t @ wih.T + h @ whh.T + b[0]
        i = jax.nn.sigmoid(g[:, :H])
        f = jax.nn.sigmoid(g[:, H:2 * H])
        gg = jnp.tanh(g[:, 2 * H:3 * H])
        o = jax.nn.sigmoid(g[:, 3 * H:])
        c = f * c + i * gg
        h = o * jnp.tanh(c)
        return (h, c), h

    h0 = jnp.zeros((B, H), jnp.float32)
    c0 = jnp.zeros((B, H), jnp.float32)
    _, hs_f = lax.scan(lambda cr, xt: step(cr, xt, p["wih_f"], p["whh_f"], p["b_f"]),
                       (h0, c0), x)
    _, hs_b_rev = lax.scan(lambda cr, xt: step(cr, xt, p["wih_b"], p["whh_b"], p["b_b"]),
                           (h0, c0), x[::-1])
    hs_b = hs_b_rev[::-1]
    lstm_out = jnp.concatenate([hs_f, hs_b], axis=-1)
    y = lstm_out[-1] @ p["wo"].T + p["bo"][0]
    return jax.nn.log_softmax(y, axis=1)


if __name__ == "__main__":
    # Small shapes consistent with the module's forward.
    T, B = 8, 2                  # seq_len, batch_size
    E, H = 32, 32                # embedding_dim, hidden_dim
    V, L = 100, 4                # vocab_size, label_size

    key = jax.random.PRNGKey(0)
    k_tok, k_par = jax.random.split(key)
    sentence = jax.random.randint(k_tok, (T, B), 0, V, dtype=jnp.int32)
    params = init_params(k_par, V, E, H, L)

    ref = reference_forward(sentence, params)

    # f32 matmul operands: exact-match validation build only.
    prep_f32 = prepare_params(params, matmul_dtype=jnp.float32)
    out_f32 = jax.block_until_ready(bilstm_sentiment_forward(sentence, prep_f32))
    assert out_f32.shape == (B, L)
    assert jnp.allclose(out_f32, ref, atol=1e-4, rtol=1e-4), (
        f"f32 mismatch:\n{out_f32}\nvs\n{ref}")

    # bf16 matmul operands (f32 accumulation + f32 gate math): recommended
    # fast path on v5e / v6e / v7x -- the MXU is bf16-native on all three.
    prep_bf16 = prepare_params(params)   # default matmul_dtype=bf16
    out_bf16 = jax.block_until_ready(bilstm_sentiment_forward(sentence, prep_bf16))
    assert out_bf16.shape == (B, L)
    assert jnp.allclose(out_bf16, ref, atol=0.15, rtol=0.1), (
        f"bf16 mismatch:\n{out_bf16}\nvs\n{ref}")

    print("KERNEL_OK")
</pallas_src>

<mosaic_0001>
module attributes {stable_mosaic.version = 11 : i64} {
  func.func @kernel(%arg0: i32, %arg1: memref<64x32xf32, #tpu.memory_space<vmem>>, %arg2: memref<32x512xf32, #tpu.memory_space<vmem>>, %arg3: memref<1x512xf32, #tpu.memory_space<vmem>>, %arg4: memref<32x512xf32, #tpu.memory_space<vmem>>, %arg5: memref<1x512xf32, #tpu.memory_space<vmem>>, %arg6: memref<128x512xf32, #tpu.memory_space<vmem>>, %arg7: memref<128x128xf32, #tpu.memory_space<vmem>>, %arg8: memref<128x128xf32, #tpu.memory_space<vmem>>, %arg9: memref<1x128xf32, #tpu.memory_space<vmem>>, %arg10: memref<8x128xf32, #tpu.memory_space<vmem>>, %arg11: memref<64x512xf32, #tpu.memory_space<vmem>>) attributes {dimension_semantics = [#tpu.dimension_semantics<arbitrary>], iteration_bounds = array<i64: 1>, scalar_prefetch = 0 : i64, scratch_operands = 1 : i64, tpu.core_type = #tpu.core_type<tc>, window_params = [{pipeline_mode = #tpu.pipeline_mode<synchronous>, transform_indices = @transform_0, window_bounds = array<i64: 64, 32>}, {pipeline_mode = #tpu.pipeline_mode<synchronous>, transform_indices = @transform_1, window_bounds = array<i64: 32, 512>}, {pipeline_mode = #tpu.pipeline_mode<synchronous>, transform_indices = @transform_2, window_bounds = array<i64: 1, 512>}, {pipeline_mode = #tpu.pipeline_mode<synchronous>, transform_indices = @transform_3, window_bounds = array<i64: 32, 512>}, {pipeline_mode = #tpu.pipeline_mode<synchronous>, transform_indices = @transform_4, window_bounds = array<i64: 1, 512>}, {pipeline_mode = #tpu.pipeline_mode<synchronous>, transform_indices = @transform_5, window_bounds = array<i64: 128, 512>}, {pipeline_mode = #tpu.pipeline_mode<synchronous>, transform_indices = @transform_6, window_bounds = array<i64: 128, 128>}, {pipeline_mode = #tpu.pipeline_mode<synchronous>, transform_indices = @transform_7, window_bounds = array<i64: 128, 128>}, {pipeline_mode = #tpu.pipeline_mode<synchronous>, transform_indices = @transform_8, window_bounds = array<i64: 1, 128>}, {pipeline_mode = #tpu.pipeline_mode<synchronous>, transform_indices = @transform_9, window_bounds = array<i64: 8, 128>}]} {
    %c0 = arith.constant 0 : index
    %c0_0 = arith.constant 0 : index
    %0 = vector.load %arg1[%c0, %c0_0] : memref<64x32xf32, #tpu.memory_space<vmem>>, vector<64x32xf32>
    %c0_1 = arith.constant 0 : index
    %c0_2 = arith.constant 0 : index
    %1 = vector.load %arg2[%c0_1, %c0_2] : memref<32x512xf32, #tpu.memory_space<vmem>>, vector<32x512xf32>
    %cst = arith.constant dense<0.000000e+00> : vector<64x512xf32>
    %2 = tpu.matmul %0, %1, %cst {dimension_numbers = #tpu.dot_dimension_numbers<[1], [0], [0], [1], [0, 0, 1, 1], [], []>} : vector<64x32xf32>, vector<32x512xf32>, vector<64x512xf32> -> vector<64x512xf32>
    %c0_3 = arith.constant 0 : index
    %c0_4 = arith.constant 0 : index
    %3 = vector.load %arg3[%c0_3, %c0_4] : memref<1x512xf32, #tpu.memory_space<vmem>>, vector<1x512xf32>
    %4 = vector.broadcast %3 : vector<1x512xf32> to vector<64x512xf32>
    %5 = arith.addf %2, %4 : vector<64x512xf32>
    %c0_5 = arith.constant 0 : index
    %c0_6 = arith.constant 0 : index
    %6 = vector.load %arg11[%c0_5, %c0_6] : memref<64x512xf32, #tpu.memory_space<vmem>>, vector<64x512xf32>
    tpu.vector_store %arg11[%c0_5, %c0_6], %5 {strides = array<i32>} : memref<64x512xf32, #tpu.memory_space<vmem>>, vector<64x512xf32>,
    %c0_7 = arith.constant 0 : index
    %c0_8 = arith.constant 0 : index
    %7 = vector.load %arg6[%c0_7, %c0_8] : memref<128x512xf32, #tpu.memory_space<vmem>>, vector<128x512xf32>
    %cst_9 = arith.constant 0.000000e+00 : f32
    %8 = vector.broadcast %cst_9 : f32 to vector<8x128xf32>
    %cst_10 = arith.constant 0.000000e+00 : f32
    %9 = vector.broadcast %cst_10 : f32 to vector<8x128xf32>
    %c0_11 = arith.constant 0 : index
    %c0_12 = arith.constant 0 : index
    %10 = vector.load %arg11[%c0_11, %c0_12] : memref<64x512xf32, #tpu.memory_space<vmem>>, vector<8x512xf32>
    %cst_13 = arith.constant dense<0.000000e+00> : vector<8x512xf32>
    %11 = tpu.matmul %8, %7, %cst_13 {dimension_numbers = #tpu.dot_dimension_numbers<[1], [0], [0], [1], [0, 0, 1, 1], [], []>} : vector<8x128xf32>, vector<128x512xf32>, vector<8x512xf32> -> vector<8x512xf32>
    %12 = arith.addf %10, %11 : vector<8x512xf32>
    %13 = vector.extract_strided_slice %12 {offsets = [0, 0], sizes = [8, 128], strides = [1, 1]} : vector<8x512xf32> to vector<8x128xf32>
    %14 = arith.negf %13 : vector<8x128xf32>
    %15 = math.exp %14 : vector<8x128xf32>
    %cst_14 = arith.constant 1.000000e+00 : f32
    %16 = vector.broadcast %cst_14 : f32 to vector<8x128xf32>
    %17 = arith.addf %16, %15 : vector<8x128xf32>
    %18 = arith.divf %16, %17 : vector<8x128xf32>
    %19 = vector.extract_strided_slice %12 {offsets = [0, 128], sizes = [8, 128], strides = [1, 1]} : vector<8x512xf32> to vector<8x128xf32>
    %20 = arith.negf %19 : vector<8x128xf32>
    %21 = math.exp %20 : vector<8x128xf32>
    %cst_15 = arith.constant 1.000000e+00 : f32
    %22 = vector.broadcast %cst_15 : f32 to vector<8x128xf32>
    %23 = arith.addf %22, %21 : vector<8x128xf32>
    %24 = arith.divf %22, %23 : vector<8x128xf32>
    %25 = vector.extract_strided_slice %12 {offsets = [0, 256], sizes = [8, 128], strides = [1, 1]} : vector<8x512xf32> to vector<8x128xf32>
    %26 = math.tanh %25 : vector<8x128xf32>
    %27 = vector.extract_strided_slice %12 {offsets = [0, 384], sizes = [8, 128], strides = [1, 1]} : vector<8x512xf32> to vector<8x128xf32>
    %28 = arith.negf %27 : vector<8x128xf32>
    %29 = math.exp %28 : vector<8x128xf32>
    %cst_16 = arith.constant 1.000000e+00 : f32
    %30 = vector.broadcast %cst_16 : f32 to vector<8x128xf32>
    %31 = arith.addf %30, %29 : vector<8x128xf32>
    %32 = arith.divf %30, %31 : vector<8x128xf32>
    %33 = arith.mulf %24, %9 : vector<8x128xf32>
    %34 = arith.mulf %18, %26 : vector<8x128xf32>
    %35 = arith.addf %33, %34 : vector<8x128xf32>
    %36 = math.tanh %35 : vector<8x128xf32>
    %37 = arith.mulf %32, %36 : vector<8x128xf32>
    %c8 = arith.constant 8 : index
    %c0_17 = arith.constant 0 : index
    %38 = vector.load %arg11[%c8, %c0_17] : memref<64x512xf32, #tpu.memory_space<vmem>>, vector<8x512xf32>
    %cst_18 = arith.constant dense<0.000000e+00> : vector<8x512xf32>
    %39 = tpu.matmul %37, %7, %cst_18 {dimension_numbers = #tpu.dot_dimension_numbers<[1], [0], [0], [1], [0, 0, 1, 1], [], []>} : vector<8x128xf32>, vector<128x512xf32>, vector<8x512xf32> -> vector<8x512xf32>
    %40 = arith.addf %38, %39 : vector<8x512xf32>
    %41 = vector.extract_strided_slice %40 {offsets = [0, 0], sizes = [8, 128], strides = [1, 1]} : vector<8x512xf32> to vector<8x128xf32>
    %42 = arith.negf %41 : vector<8x128xf32>
    %43 = math.exp %42 : vector<8x128xf32>
    %cst_19 = arith.constant 1.000000e+00 : f32
    %44 = vector.broadcast %cst_19 : f32 to vector<8x128xf32>
    %45 = arith.addf %44, %43 : vector<8x128xf32>
    %46 = arith.divf %44, %45 : vector<8x128xf32>
    %47 = vector.extract_strided_slice %40 {offsets = [0, 128], sizes = [8, 128], strides = [1, 1]} : vector<8x512xf32> to vector<8x128xf32>
    %48 = arith.negf %47 : vector<8x128xf32>
    %49 = math.exp %48 : vector<8x128xf32>
    %cst_20 = arith.constant 1.000000e+00 : f32
    %50 = vector.broadcast %cst_20 : f32 to vector<8x128xf32>
    %51 = arith.addf %50, %49 : vector<8x128xf32>
    %52 = arith.divf %50, %51 : vector<8x128xf32>
    %53 = vector.extract_strided_slice %40 {offsets = [0, 256], sizes = [8, 128], strides = [1, 1]} : vector<8x512xf32> to vector<8x128xf32>
    %54 = math.tanh %53 : vector<8x128xf32>
    %55 = vector.extract_strided_slice %40 {offsets = [0, 384], sizes = [8, 128], strides = [1, 1]} : vector<8x512xf32> to vector<8x128xf32>
    %56 = arith.negf %55 : vector<8x128xf32>
    %57 = math.exp %56 : vector<8x128xf32>
    %cst_21 = arith.constant 1.000000e+00 : f32
    %58 = vector.broadcast %cst_21 : f32 to vector<8x128xf32>
    %59 = arith.addf %58, %57 : vector<8x128xf32>
    %60 = arith.divf %58, %59 : vector<8x128xf32>
    %61 = arith.mulf %52, %35 : vector<8x128xf32>
    %62 = arith.mulf %46, %54 : vector<8x128xf32>
    %63 = arith.addf %61, %62 : vector<8x128xf32>
    %64 = math.tanh %63 : vector<8x128xf32>
    %65 = arith.mulf %60, %64 : vector<8x128xf32>
    %c16 = arith.constant 16 : index
    %c0_22 = arith.constant 0 : index
    %66 = vector.load %arg11[%c16, %c0_22] : memref<64x512xf32, #tpu.memory_space<vmem>>, vector<8x512xf32>
    %cst_23 = arith.constant dense<0.000000e+00> : vector<8x512xf32>
    %67 = tpu.matmul %65, %7, %cst_23 {dimension_numbers = #tpu.dot_dimension_numbers<[1], [0], [0], [1], [0, 0, 1, 1], [], []>} : vector<8x128xf32>, vector<128x512xf32>, vector<8x512xf32> -> vector<8x512xf32>
    %68 = arith.addf %66, %67 : vector<8x512xf32>
    %69 = vector.extract_strided_slice %68 {offsets = [0, 0], sizes = [8, 128], strides = [1, 1]} : vector<8x512xf32> to vector<8x128xf32>
    %70 = arith.negf %69 : vector<8x128xf32>
    %71 = math.exp %70 : vector<8x128xf32>
    %cst_24 = arith.constant 1.000000e+00 : f32
    %72 = vector.broadcast %cst_24 : f32 to vector<8x128xf32>
    %73 = arith.addf %72, %71 : vector<8x128xf32>
    %74 = arith.divf %72, %73 : vector<8x128xf32>
    %75 = vector.extract_strided_slice %68 {offsets = [0, 128], sizes = [8, 128], strides = [1, 1]} : vector<8x512xf32> to vector<8x128xf32>
    %76 = arith.negf %75 : vector<8x128xf32>
    %77 = math.exp %76 : vector<8x128xf32>
    %cst_25 = arith.constant 1.000000e+00 : f32
    %78 = vector.broadcast %cst_25 : f32 to vector<8x128xf32>
    %79 = arith.addf %78, %77 : vector<8x128xf32>
    %80 = arith.divf %78, %79 : vector<8x128xf32>
    %81 = vector.extract_strided_slice %68 {offsets = [0, 256], sizes = [8, 128], strides = [1, 1]} : vector<8x512xf32> to vector<8x128xf32>
    %82 = math.tanh %81 : vector<8x128xf32>
    %83 = vector.extract_strided_slice %68 {offsets = [0, 384], sizes = [8, 128], strides = [1, 1]} : vector<8x512xf32> to vector<8x128xf32>
    %84 = arith.negf %83 : vector<8x128xf32>
    %85 = math.exp %84 : vector<8x128xf32>
    %cst_26 = arith.constant 1.000000e+00 : f32
    %86 = vector.broadcast %cst_26 : f32 to vector<8x128xf32>
    %87 = arith.addf %86, %85 : vector<8x128xf32>
    %88 = arith.divf %86, %87 : vector<8x128xf32>
    %89 = arith.mulf %80, %63 : vector<8x128xf32>
    %90 = arith.mulf %74, %82 : vector<8x128xf32>
    %91 = arith.addf %89, %90 : vector<8x128xf32>
    %92 = math.tanh %91 : vector<8x128xf32>
    %93 = arith.mulf %88, %92 : vector<8x128xf32>
    %c24 = arith.constant 24 : index
    %c0_27 = arith.constant 0 : index
    %94 = vector.load %arg11[%c24, %c0_27] : memref<64x512xf32, #tpu.memory_space<vmem>>, vector<8x512xf32>
    %cst_28 = arith.constant dense<0.000000e+00> : vector<8x512xf32>
    %95 = tpu.matmul %93, %7, %cst_28 {dimension_numbers = #tpu.dot_dimension_numbers<[1], [0], [0], [1], [0, 0, 1, 1], [], []>} : vector<8x128xf32>, vector<128x512xf32>, vector<8x512xf32> -> vector<8x512xf32>
    %96 = arith.addf %94, %95 : vector<8x512xf32>
    %97 = vector.extract_strided_slice %96 {offsets = [0, 0], sizes = [8, 128], strides = [1, 1]} : vector<8x512xf32> to vector<8x128xf32>
    %98 = arith.negf %97 : vector<8x128xf32>
    %99 = math.exp %98 : vector<8x128xf32>
    %cst_29 = arith.constant 1.000000e+00 : f32
    %100 = vector.broadcast %cst_29 : f32 to vector<8x128xf32>
    %101 = arith.addf %100, %99 : vector<8x128xf32>
    %102 = arith.divf %100, %101 : vector<8x128xf32>
    %103 = vector.extract_strided_slice %96 {offsets = [0, 128], sizes = [8, 128], strides = [1, 1]} : vector<8x512xf32> to vector<8x128xf32>
    %104 = arith.negf %103 : vector<8x128xf32>
    %105 = math.exp %104 : vector<8x128xf32>
    %cst_30 = arith.constant 1.000000e+00 : f32
    %106 = vector.broadcast %cst_30 : f32 to vector<8x128xf32>
    %107 = arith.addf %106, %105 : vector<8x128xf32>
    %108 = arith.divf %106, %107 : vector<8x128xf32>
    %109 = vector.extract_strided_slice %96 {offsets = [0, 256], sizes = [8, 128], strides = [1, 1]} : vector<8x512xf32> to vector<8x128xf32>
    %110 = math.tanh %109 : vector<8x128xf32>
    %111 = vector.extract_strided_slice %96 {offsets = [0, 384], sizes = [8, 128], strides = [1, 1]} : vector<8x512xf32> to vector<8x128xf32>
    %112 = arith.negf %111 : vector<8x128xf32>
    %113 = math.exp %112 : vector<8x128xf32>
    %cst_31 = arith.constant 1.000000e+00 : f32
    %114 = vector.broadcast %cst_31 : f32 to vector<8x128xf32>
    %115 = arith.addf %114, %113 : vector<8x128xf32>
    %116 = arith.divf %114, %115 : vector<8x128xf32>
    %117 = arith.mulf %108, %91 : vector<8x128xf32>
    %118 = arith.mulf %102, %110 : vector<8x128xf32>
    %119 = arith.addf %117, %118 : vector<8x128xf32>
    %120 = math.tanh %119 : vector<8x128xf32>
    %121 = arith.mulf %116, %120 : vector<8x128xf32>
    %c32 = arith.constant 32 : index
    %c0_32 = arith.constant 0 : index
    %122 = vector.load %arg11[%c32, %c0_32] : memref<64x512xf32, #tpu.memory_space<vmem>>, vector<8x512xf32>
    %cst_33 = arith.constant dense<0.000000e+00> : vector<8x512xf32>
    %123 = tpu.matmul %121, %7, %cst_33 {dimension_numbers = #tpu.dot_dimension_numbers<[1], [0], [0], [1], [0, 0, 1, 1], [], []>} : vector<8x128xf32>, vector<128x512xf32>, vector<8x512xf32> -> vector<8x512xf32>
    %124 = arith.addf %122, %123 : vector<8x512xf32>
    %125 = vector.extract_strided_slice %124 {offsets = [0, 0], sizes = [8, 128], strides = [1, 1]} : vector<8x512xf32> to vector<8x128xf32>
    %126 = arith.negf %125 : vector<8x128xf32>
    %127 = math.exp %126 : vector<8x128xf32>
    %cst_34 = arith.constant 1.000000e+00 : f32
    %128 = vector.broadcast %cst_34 : f32 to vector<8x128xf32>
    %129 = arith.addf %128, %127 : vector<8x128xf32>
    %130 = arith.divf %128, %129 : vector<8x128xf32>
    %131 = vector.extract_strided_slice %124 {offsets = [0, 128], sizes = [8, 128], strides = [1, 1]} : vector<8x512xf32> to vector<8x128xf32>
    %132 = arith.negf %131 : vector<8x128xf32>
    %133 = math.exp %132 : vector<8x128xf32>
    %cst_35 = arith.constant 1.000000e+00 : f32
    %134 = vector.broadcast %cst_35 : f32 to vector<8x128xf32>
    %135 = arith.addf %134, %133 : vector<8x128xf32>
    %136 = arith.divf %134, %135 : vector<8x128xf32>
    %137 = vector.extract_strided_slice %124 {offsets = [0, 256], sizes = [8, 128], strides = [1, 1]} : vector<8x512xf32> to vector<8x128xf32>
    %138 = math.tanh %137 : vector<8x128xf32>
    %139 = vector.extract_strided_slice %124 {offsets = [0, 384], sizes = [8, 128], strides = [1, 1]} : vector<8x512xf32> to vector<8x128xf32>
    %140 = arith.negf %139 : vector<8x128xf32>
    %141 = math.exp %140 : vector<8x128xf32>
    %cst_36 = arith.constant 1.000000e+00 : f32
    %142 = vector.broadcast %cst_36 : f32 to vector<8x128xf32>
    %143 = arith.addf %142, %141 : vector<8x128xf32>
    %144 = arith.divf %142, %143 : vector<8x128xf32>
    %145 = arith.mulf %136, %119 : vector<8x128xf32>
    %146 = arith.mulf %130, %138 : vector<8x128xf32>
    %147 = arith.addf %145, %146 : vector<8x128xf32>
    %148 = math.tanh %147 : vector<8x128xf32>
    %149 = arith.mulf %144, %148 : vector<8x128xf32>
    %c40 = arith.constant 40 : index
    %c0_37 = arith.constant 0 : index
    %150 = vector.load %arg11[%c40, %c0_37] : memref<64x512xf32, #tpu.memory_space<vmem>>, vector<8x512xf32>
    %cst_38 = arith.constant dense<0.000000e+00> : vector<8x512xf32>
    %151 = tpu.matmul %149, %7, %cst_38 {dimension_numbers = #tpu.dot_dimension_numbers<[1], [0], [0], [1], [0, 0, 1, 1], [], []>} : vector<8x128xf32>, vector<128x512xf32>, vector<8x512xf32> -> vector<8x512xf32>
    %152 = arith.addf %150, %151 : vector<8x512xf32>
    %153 = vector.extract_strided_slice %152 {offsets = [0, 0], sizes = [8, 128], strides = [1, 1]} : vector<8x512xf32> to vector<8x128xf32>
    %154 = arith.negf %153 : vector<8x128xf32>
    %155 = math.exp %154 : vector<8x128xf32>
    %cst_39 = arith.constant 1.000000e+00 : f32
    %156 = vector.broadcast %cst_39 : f32 to vector<8x128xf32>
    %157 = arith.addf %156, %155 : vector<8x128xf32>
    %158 = arith.divf %156, %157 : vector<8x128xf32>
    %159 = vector.extract_strided_slice %152 {offsets = [0, 128], sizes = [8, 128], strides = [1, 1]} : vector<8x512xf32> to vector<8x128xf32>
    %160 = arith.negf %159 : vector<8x128xf32>
    %161 = math.exp %160 : vector<8x128xf32>
    %cst_40 = arith.constant 1.000000e+00 : f32
    %162 = vector.broadcast %cst_40 : f32 to vector<8x128xf32>
    %163 = arith.addf %162, %161 : vector<8x128xf32>
    %164 = arith.divf %162, %163 : vector<8x128xf32>
    %165 = vector.extract_strided_slice %152 {offsets = [0, 256], sizes = [8, 128], strides = [1, 1]} : vector<8x512xf32> to vector<8x128xf32>
    %166 = math.tanh %165 : vector<8x128xf32>
    %167 = vector.extract_strided_slice %152 {offsets = [0, 384], sizes = [8, 128], strides = [1, 1]} : vector<8x512xf32> to vector<8x128xf32>
    %168 = arith.negf %167 : vector<8x128xf32>
    %169 = math.exp %168 : vector<8x128xf32>
    %cst_41 = arith.constant 1.000000e+00 : f32
    %170 = vector.broadcast %cst_41 : f32 to vector<8x128xf32>
    %171 = arith.addf %170, %169 : vector<8x128xf32>
    %172 = arith.divf %170, %171 : vector<8x128xf32>
    %173 = arith.mulf %164, %147 : vector<8x128xf32>
    %174 = arith.mulf %158, %166 : vector<8x128xf32>
    %175 = arith.addf %173, %174 : vector<8x128xf32>
    %176 = math.tanh %175 : vector<8x128xf32>
    %177 = arith.mulf %172, %176 : vector<8x128xf32>
    %c48 = arith.constant 48 : index
    %c0_42 = arith.constant 0 : index
    %178 = vector.load %arg11[%c48, %c0_42] : memref<64x512xf32, #tpu.memory_space<vmem>>, vector<8x512xf32>
    %cst_43 = arith.constant dense<0.000000e+00> : vector<8x512xf32>
    %179 = tpu.matmul %177, %7, %cst_43 {dimension_numbers = #tpu.dot_dimension_numbers<[1], [0], [0], [1], [0, 0, 1, 1], [], []>} : vector<8x128xf32>, vector<128x512xf32>, vector<8x512xf32> -> vector<8x512xf32>
    %180 = arith.addf %178, %179 : vector<8x512xf32>
    %181 = vector.extract_strided_slice %180 {offsets = [0, 0], sizes = [8, 128], strides = [1, 1]} : vector<8x512xf32> to vector<8x128xf32>
    %182 = arith.negf %181 : vector<8x128xf32>
    %183 = math.exp %182 : vector<8x128xf32>
    %cst_44 = arith.constant 1.000000e+00 : f32
    %184 = vector.broadcast %cst_44 : f32 to vector<8x128xf32>
    %185 = arith.addf %184, %183 : vector<8x128xf32>
    %186 = arith.divf %184, %185 : vector<8x128xf32>
    %187 = vector.extract_strided_slice %180 {offsets = [0, 128], sizes = [8, 128], strides = [1, 1]} : vector<8x512xf32> to vector<8x128xf32>
    %188 = arith.negf %187 : vector<8x128xf32>
    %189 = math.exp %188 : vector<8x128xf32>
    %cst_45 = arith.constant 1.000000e+00 : f32
    %190 = vector.broadcast %cst_45 : f32 to vector<8x128xf32>
    %191 = arith.addf %190, %189 : vector<8x128xf32>
    %192 = arith.divf %190, %191 : vector<8x128xf32>
    %193 = vector.extract_strided_slice %180 {offsets = [0, 256], sizes = [8, 128], strides = [1, 1]} : vector<8x512xf32> to vector<8x128xf32>
    %194 = math.tanh %193 : vector<8x128xf32>
    %195 = vector.extract_strided_slice %180 {offsets = [0, 384], sizes = [8, 128], strides = [1, 1]} : vector<8x512xf32> to vector<8x128xf32>
    %196 = arith.negf %195 : vector<8x128xf32>
    %197 = math.exp %196 : vector<8x128xf32>
    %cst_46 = arith.constant 1.000000e+00 : f32
    %198 = vector.broadcast %cst_46 : f32 to vector<8x128xf32>
    %199 = arith.addf %198, %197 : vector<8x128xf32>
    %200 = arith.divf %198, %199 : vector<8x128xf32>
    %201 = arith.mulf %192, %175 : vector<8x128xf32>
    %202 = arith.mulf %186, %194 : vector<8x128xf32>
    %203 = arith.addf %201, %202 : vector<8x128xf32>
    %204 = math.tanh %203 : vector<8x128xf32>
    %205 = arith.mulf %200, %204 : vector<8x128xf32>
    %c56 = arith.constant 56 : index
    %c0_47 = arith.constant 0 : index
    %206 = vector.load %arg11[%c56, %c0_47] : memref<64x512xf32, #tpu.memory_space<vmem>>, vector<8x512xf32>
    %cst_48 = arith.constant dense<0.000000e+00> : vector<8x512xf32>
    %207 = tpu.matmul %205, %7, %cst_48 {dimension_numbers = #tpu.dot_dimension_numbers<[1], [0], [0], [1], [0, 0, 1, 1], [], []>} : vector<8x128xf32>, vector<128x512xf32>, vector<8x512xf32> -> vector<8x512xf32>
    %208 = arith.addf %206, %207 : vector<8x512xf32>
    %209 = vector.extract_strided_slice %208 {offsets = [0, 0], sizes = [8, 128], strides = [1, 1]} : vector<8x512xf32> to vector<8x128xf32>
    %210 = arith.negf %209 : vector<8x128xf32>
    %211 = math.exp %210 : vector<8x128xf32>
    %cst_49 = arith.constant 1.000000e+00 : f32
    %212 = vector.broadcast %cst_49 : f32 to vector<8x128xf32>
    %213 = arith.addf %212, %211 : vector<8x128xf32>
    %214 = arith.divf %212, %213 : vector<8x128xf32>
    %215 = vector.extract_strided_slice %208 {offsets = [0, 128], sizes = [8, 128], strides = [1, 1]} : vector<8x512xf32> to vector<8x128xf32>
    %216 = arith.negf %215 : vector<8x128xf32>
    %217 = math.exp %216 : vector<8x128xf32>
    %cst_50 = arith.constant 1.000000e+00 : f32
    %218 = vector.broadcast %cst_50 : f32 to vector<8x128xf32>
    %219 = arith.addf %218, %217 : vector<8x128xf32>
    %220 = arith.divf %218, %219 : vector<8x128xf32>
    %221 = vector.extract_strided_slice %208 {offsets = [0, 256], sizes = [8, 128], strides = [1, 1]} : vector<8x512xf32> to vector<8x128xf32>
    %222 = math.tanh %221 : vector<8x128xf32>
    %223 = vector.extract_strided_slice %208 {offsets = [0, 384], sizes = [8, 128], strides = [1, 1]} : vector<8x512xf32> to vector<8x128xf32>
    %224 = arith.negf %223 : vector<8x128xf32>
    %225 = math.exp %224 : vector<8x128xf32>
    %cst_51 = arith.constant 1.000000e+00 : f32
    %226 = vector.broadcast %cst_51 : f32 to vector<8x128xf32>
    %227 = arith.addf %226, %225 : vector<8x128xf32>
    %228 = arith.divf %226, %227 : vector<8x128xf32>
    %229 = arith.mulf %220, %203 : vector<8x128xf32>
    %230 = arith.mulf %214, %222 : vector<8x128xf32>
    %231 = arith.addf %229, %230 : vector<8x128xf32>
    %232 = math.tanh %231 : vector<8x128xf32>
    %233 = arith.mulf %228, %232 : vector<8x128xf32>
    %c56_52 = arith.constant 56 : index
    %c0_53 = arith.constant 0 : index
    %234 = vector.load %arg1[%c56_52, %c0_53] : memref<64x32xf32, #tpu.memory_space<vmem>>, vector<8x32xf32>
    %c0_54 = arith.constant 0 : index
    %c0_55 = arith.constant 0 : index
    %235 = vector.load %arg4[%c0_54, %c0_55] : memref<32x512xf32, #tpu.memory_space<vmem>>, vector<32x512xf32>
    %cst_56 = arith.constant dense<0.000000e+00> : vector<8x512xf32>
    %236 = tpu.matmul %234, %235, %cst_56 {dimension_numbers = #tpu.dot_dimension_numbers<[1], [0], [0], [1], [0, 0, 1, 1], [], []>} : vector<8x32xf32>, vector<32x512xf32>, vector<8x512xf32> -> vector<8x512xf32>
    %c0_57 = arith.constant 0 : index
    %c0_58 = arith.constant 0 : index
    %237 = vector.load %arg5[%c0_57, %c0_58] : memref<1x512xf32, #tpu.memory_space<vmem>>, vector<1x512xf32>
    %238 = vector.broadcast %237 : vector<1x512xf32> to vector<8x512xf32>
    %239 = arith.addf %236, %238 : vector<8x512xf32>
    %cst_59 = arith.constant 0.000000e+00 : f32
    %240 = vector.broadcast %cst_59 : f32 to vector<8x128xf32>
    %241 = vector.extract_strided_slice %239 {offsets = [0, 0], sizes = [8, 128], strides = [1, 1]} : vector<8x512xf32> to vector<8x128xf32>
    %242 = arith.negf %241 : vector<8x128xf32>
    %243 = math.exp %242 : vector<8x128xf32>
    %cst_60 = arith.constant 1.000000e+00 : f32
    %244 = vector.broadcast %cst_60 : f32 to vector<8x128xf32>
    %245 = arith.addf %244, %243 : vector<8x128xf32>
    %246 = arith.divf %244, %245 : vector<8x128xf32>
    %247 = vector.extract_strided_slice %239 {offsets = [0, 128], sizes = [8, 128], strides = [1, 1]} : vector<8x512xf32> to vector<8x128xf32>
    %248 = arith.negf %247 : vector<8x128xf32>
    %249 = math.exp %248 : vector<8x128xf32>
    %cst_61 = arith.constant 1.000000e+00 : f32
    %250 = vector.broadcast %cst_61 : f32 to vector<8x128xf32>
    %251 = arith.addf %250, %249 : vector<8x128xf32>
    %252 = arith.divf %250, %251 : vector<8x128xf32>
    %253 = vector.extract_strided_slice %239 {offsets = [0, 256], sizes = [8, 128], strides = [1, 1]} : vector<8x512xf32> to vector<8x128xf32>
    %254 = math.tanh %253 : vector<8x128xf32>
    %255 = vector.extract_strided_slice %239 {offsets = [0, 384], sizes = [8, 128], strides = [1, 1]} : vector<8x512xf32> to vector<8x128xf32>
    %256 = arith.negf %255 : vector<8x128xf32>
    %257 = math.exp %256 : vector<8x128xf32>
    %cst_62 = arith.constant 1.000000e+00 : f32
    %258 = vector.broadcast %cst_62 : f32 to vector<8x128xf32>
    %259 = arith.addf %258, %257 : vector<8x128xf32>
    %260 = arith.divf %258, %259 : vector<8x128xf32>
    %261 = arith.mulf %252, %240 : vector<8x128xf32>
    %262 = arith.mulf %246, %254 : vector<8x128xf32>
    %263 = arith.addf %261, %262 : vector<8x128xf32>
    %264 = math.tanh %263 : vector<8x128xf32>
    %265 = arith.mulf %260, %264 : vector<8x128xf32>
    %c0_63 = arith.constant 0 : index
    %c0_64 = arith.constant 0 : index
    %266 = vector.load %arg7[%c0_63, %c0_64] : memref<128x128xf32, #tpu.memory_space<vmem>>, vector<128x128xf32>
    %cst_65 = arith.constant dense<0.000000e+00> : vector<8x128xf32>
    %267 = tpu.matmul %233, %266, %cst_65 {dimension_numbers = #tpu.dot_dimension_numbers<[1], [0], [0], [1], [0, 0, 1, 1], [], []>} : vector<8x128xf32>, vector<128x128xf32>, vector<8x128xf32> -> vector<8x128xf32>
    %c0_66 = arith.constant 0 : index
    %c0_67 = arith.constant 0 : index
    %268 = vector.load %arg8[%c0_66, %c0_67] : memref<128x128xf32, #tpu.memory_space<vmem>>, vector<128x128xf32>
    %cst_68 = arith.constant dense<0.000000e+00> : vector<8x128xf32>
    %269 = tpu.matmul %265, %268, %cst_68 {dimension_numbers = #tpu.dot_dimension_numbers<[1], [0], [0], [1], [0, 0, 1, 1], [], []>} : vector<8x128xf32>, vector<128x128xf32>, vector<8x128xf32> -> vector<8x128xf32>
    %270 = arith.addf %267, %269 : vector<8x128xf32>
    %c0_69 = arith.constant 0 : index
    %c0_70 = arith.constant 0 : index
    %271 = vector.load %arg9[%c0_69, %c0_70] : memref<1x128xf32, #tpu.memory_space<vmem>>, vector<1x128xf32>
    %272 = vector.broadcast %271 : vector<1x128xf32> to vector<8x128xf32>
    %273 = arith.addf %270, %272 : vector<8x128xf32>
    %274 = tpu.iota {dimensions = array<i32: 1>} : vector<8x128xi32>
    %c4_i32 = arith.constant 4 : i32
    %275 = vector.broadcast %c4_i32 : i32 to vector<8x128xi32>
    %276 = arith.cmpi slt, %274, %275 : vector<8x128xi32>
    %cst_71 = arith.constant -1.000000e+30 : f32
    %277 = vector.broadcast %cst_71 : f32 to vector<8x128xf32>
    %278 = arith.select %276, %273, %277 : vector<8x128xi1>, vector<8x128xf32>
    %cst_72 = arith.constant dense<0xFF800000> : vector<8xf32>
    %279 = vector.multi_reduction <maximumf>, %278, %cst_72 [1] : vector<8x128xf32> to vector<8xf32>
    %280 = vector.shape_cast %279 : vector<8xf32> to vector<8x1xf32>
    %281 = vector.broadcast %280 : vector<8x1xf32> to vector<8x128xf32>
    %282 = arith.subf %278, %281 : vector<8x128xf32>
    %283 = math.exp %282 : vector<8x128xf32>
    %cst_73 = arith.constant dense<0.000000e+00> : vector<8xf32>
    %284 = vector.multi_reduction <add>, %283, %cst_73 [1] : vector<8x128xf32> to vector<8xf32>
    %285 = vector.shape_cast %284 : vector<8xf32> to vector<8x1xf32>
    %286 = math.log %285 : vector<8x1xf32>
    %287 = vector.broadcast %286 : vector<8x1xf32> to vector<8x128xf32>
    %288 = arith.subf %282, %287 : vector<8x128xf32>
    %c0_74 = arith.constant 0 : index
    %c0_75 = arith.constant 0 : index
    %289 = vector.load %arg10[%c0_74, %c0_75] : memref<8x128xf32, #tpu.memory_space<vmem>>, vector<8x128xf32>
    tpu.vector_store %arg10[%c0_74, %c0_75], %288 {strides = array<i32>} : memref<8x128xf32, #tpu.memory_space<vmem>>, vector<8x128xf32>,
    return
  }
  func.func @transform_0(%arg0: i32) -> (i32, i32) {
    %c0_i32 = arith.constant 0 : i32
    %c0_i32_0 = arith.constant 0 : i32
    %c0_i32_1 = arith.constant 0 : i32
    return %c0_i32, %c0_i32_0 : i32, i32
  }
  func.func @transform_1(%arg0: i32) -> (i32, i32) {
    %c0_i32 = arith.constant 0 : i32
    %c0_i32_0 = arith.constant 0 : i32
    %c0_i32_1 = arith.constant 0 : i32
    return %c0_i32, %c0_i32_0 : i32, i32
  }
  func.func @transform_2(%arg0: i32) -> (i32, i32) {
    %c0_i32 = arith.constant 0 : i32
    %c0_i32_0 = arith.constant 0 : i32
    %c0_i32_1 = arith.constant 0 : i32
    return %c0_i32, %c0_i32_0 : i32, i32
  }
  func.func @transform_3(%arg0: i32) -> (i32, i32) {
    %c0_i32 = arith.constant 0 : i32
    %c0_i32_0 = arith.constant 0 : i32
    %c0_i32_1 = arith.constant 0 : i32
    return %c0_i32, %c0_i32_0 : i32, i32
  }
  func.func @transform_4(%arg0: i32) -> (i32, i32) {
    %c0_i32 = arith.constant 0 : i32
    %c0_i32_0 = arith.constant 0 : i32
    %c0_i32_1 = arith.constant 0 : i32
    return %c0_i32, %c0_i32_0 : i32, i32
  }
  func.func @transform_5(%arg0: i32) -> (i32, i32) {
    %c0_i32 = arith.constant 0 : i32
    %c0_i32_0 = arith.constant 0 : i32
    %c0_i32_1 = arith.constant 0 : i32
    return %c0_i32, %c0_i32_0 : i32, i32
  }
  func.func @transform_6(%arg0: i32) -> (i32, i32) {
    %c0_i32 = arith.constant 0 : i32
    %c0_i32_0 = arith.constant 0 : i32
    %c0_i32_1 = arith.constant 0 : i32
    return %c0_i32, %c0_i32_0 : i32, i32
  }
  func.func @transform_7(%arg0: i32) -> (i32, i32) {
    %c0_i32 = arith.constant 0 : i32
    %c0_i32_0 = arith.constant 0 : i32
    %c0_i32_1 = arith.constant 0 : i32
    return %c0_i32, %c0_i32_0 : i32, i32
  }
  func.func @transform_8(%arg0: i32) -> (i32, i32) {
    %c0_i32 = arith.constant 0 : i32
    %c0_i32_0 = arith.constant 0 : i32
    %c0_i32_1 = arith.constant 0 : i32
    return %c0_i32, %c0_i32_0 : i32, i32
  }
  func.func @transform_9(%arg0: i32) -> (i32, i32) {
    %c0_i32 = arith.constant 0 : i32
    %c0_i32_0 = arith.constant 0 : i32
    %c0_i32_1 = arith.constant 0 : i32
    return %c0_i32, %c0_i32_0 : i32, i32
  }
}

</mosaic_0001>

<bundles_post_ra>
// kernel: tpu_custom_call.1
= control target key start
LH: loop header
LB: loop body
LE: loop exit
PB: predicated region body
PF: predicated region fallthrough
CT: control target
= control target key end

     0   :  { %14 = vsyncpa [#allocation4], 0  ;;  %s3963_s0 = inlined_call_operand.vmem [shape: f32[64,32], index: 0, kind: input, shape index: {}]   ;;  %s3964_s1 = inlined_call_operand.hbm [shape: f32[32,512], index: 1, kind: input, shape index: {}]   ;;  %s3965_s2 = inlined_call_operand.vmem [shape: f32[1,512], index: 2, kind: input, shape index: {}]   ;;  %s3966_s3 = inlined_call_operand.hbm [shape: f32[32,512], index: 3, kind: input, shape index: {}]   ;;  %s3967_s4 = inlined_call_operand.vmem [shape: f32[1,512], index: 4, kind: input, shape index: {}]   ;;  %s3968_s5 = inlined_call_operand.hbm [shape: f32[128,512], index: 5, kind: input, shape index: {}]   ;;  %s3969_s6 = inlined_call_operand.hbm [shape: f32[128,128], index: 6, kind: input, shape index: {}]   ;;  %s3970_s7 = inlined_call_operand.hbm [shape: f32[128,128], index: 7, kind: input, shape index: {}]   ;;  %s3971_s8 = inlined_call_operand.vmem [shape: f32[1,128], index: 8, kind: input, shape index: {}]   ;;  %s3972_s9 = inlined_call_operand.hbm [shape: f32[8,128], index: 9, kind: output, shape index: {}]  }
   0x1   :  { %15 = vsyncpa [#allocation7], 0 }
   0x2   :  { %16 = vsyncpa [#allocation10], 0 }
   0x3   :  { %17 = vsyncpa [#allocation5], 0  ;;  %s2808_s30 = smov [#allocation6]   ;;  %s2809_s11 = smov [#allocation9]  }
   0x4   :  { %s39_s10 = sshll.u32 %s2808_s30, 4  ;;  %s65_s12 = sshll.u32 %s2809_s11, 4  ;;  %s40_s10 = int_to_ptr.vmem [resolvable:$true] %s39_s10  ;;  %s66_s12 = int_to_ptr.vmem [resolvable:$true] %s65_s12 }
   0x5   :  { %s2688_s13 = scalar_lea.vmem %s40_s10, 2048  ;;  %p2693_p1 = scmp.lt.s32.totalorder %s40_s10, %s40_s10 }
   0x6   :  { %p2689_p0 = scmp.ne.s32.totalorder %s40_s10, %s2688_s13  ;;  %p2694_p2 = scmp.lt.s32.totalorder %s2688_s13, %s2688_s13 }
   0x8   :  { %p2695_p3 = por %p2694_p2, %p2693_p1 }
   0xa   :  { %p2696_p4 = pnand %p2695_p3, %p2689_p0 }
   0xc   :  { %2699 = shalt.err (!%p2696_p4)
}
   0xd   :  { %s2810_s14 = smov 512   ;;  %s2811_s15 = smov 32  }
   0xe   :  { %45 = dma.hbm_to_vmem [thread:$0]  %s3966_s3, 2048, %s40_s10, [#allocation7], %s2810_s14, %s2810_s14, %s2811_s15  }
   0xf   :  { %s2708_s18 = scalar_lea.vmem %s66_s12, 2048  ;;  %p2713_p6 = scmp.lt.s32.totalorder %s66_s12, %s66_s12 }
  0x10   :  { %p2709_p5 = scmp.ne.s32.totalorder %s66_s12, %s2708_s18  ;;  %p2714_p7 = scmp.lt.s32.totalorder %s2708_s18, %s2708_s18 }
  0x12   :  { %p2715_p8 = por %p2714_p7, %p2713_p6 }
  0x14   :  { %p2716_p9 = pnand %p2715_p8, %p2709_p5 }
  0x16   :  { %2719 = shalt.err (!%p2716_p9)
}
  0x17   :  { %s2812_s19 = smov 128   ;;  %s2813_s20 = smov 8  }
  0x18   :  { %71 = dma.hbm_to_vmem [thread:$0]  %s3969_s6, 2048, %s66_s12, [#allocation10], %s2812_s19, %s2812_s19, %s2813_s20  }
  0x19   :  { %s2814_s23 = smov [#allocation3]   ;;  %s2815_s25 = smov [#allocation8]  }
  0x1a   :  { %s25_s24 = sshll.u32 %s2814_s23, 4  ;;  %s53_s3 = sshll.u32 %s2815_s25, 4  ;;  %s26_s24 = int_to_ptr.vmem [resolvable:$true] %s25_s24  ;;  %s54_s3 = int_to_ptr.vmem [resolvable:$true] %s53_s3 }
  0x1b   :  { %s2728_s26 = scalar_lea.vmem %s26_s24, 2048  ;;  %p2733_p11 = scmp.lt.s32.totalorder %s26_s24, %s26_s24 }
  0x1c   :  { %p2729_p10 = scmp.ne.s32.totalorder %s26_s24, %s2728_s26  ;;  %p2734_p12 = scmp.lt.s32.totalorder %s2728_s26, %s2728_s26 }
  0x1e   :  { %p2735_p13 = por %p2734_p12, %p2733_p11 }
  0x20   :  { %p2736_p0 = pnand %p2735_p13, %p2729_p10 }
  0x22   :  { %2739 = shalt.err (!%p2736_p0)
}
  0x23   :  { %31 = dma.hbm_to_vmem [thread:$0]  %s3964_s1, 2048, %s26_s24, [#allocation4], %s2810_s14, %s2810_s14, %s2811_s15  }
  0x24   :  { %s2748_s6 = scalar_lea.vmem %s54_s3, 8192  ;;  %p2753_p2 = scmp.lt.s32.totalorder %s54_s3, %s54_s3 }
  0x25   :  { %p2749_p1 = scmp.ne.s32.totalorder %s54_s3, %s2748_s6  ;;  %p2754_p3 = scmp.lt.s32.totalorder %s2748_s6, %s2748_s6 }
  0x27   :  { %p2755_p4 = por %p2754_p3, %p2753_p2 }
  0x29   :  { %p2756_p5 = pnand %p2755_p4, %p2749_p1 }
  0x2b   :  { %2759 = shalt.err (!%p2756_p5)
}
  0x2c   :  { %59 = dma.hbm_to_vmem [thread:$0]  %s3968_s5, 8192, %s54_s3, [#allocation7], %s2810_s14, %s2810_s14, %s2811_s15  }
  0x2d   :  { %s2816_s10 = smov [#allocation11]  }
  0x2e   :  { %s77_s11 = sshll.u32 %s2816_s10, 4  ;;  %s78_s11 = int_to_ptr.vmem [resolvable:$true] %s77_s11 }
  0x2f   :  { %s2768_s12 = scalar_lea.vmem %s78_s11, 2048  ;;  %p2773_p7 = scmp.lt.s32.totalorder %s78_s11, %s78_s11 }
  0x30   :  { %p2769_p6 = scmp.ne.s32.totalorder %s78_s11, %s2768_s12  ;;  %p2774_p8 = scmp.lt.s32.totalorder %s2768_s12, %s2768_s12 }
  0x32   :  { %p2775_p9 = por %p2774_p8, %p2773_p7 }
  0x34   :  { %p2776_p10 = pnand %p2775_p9, %p2769_p6 }
  0x36   :  { %2779 = shalt.err (!%p2776_p10)
}
  0x37   :  { %83 = dma.hbm_to_vmem [thread:$0]  %s3970_s7, 2048, %s78_s11, [#allocation10], %s2812_s19, %s2812_s19, %s2813_s20  }
  0x38   :  { %2800 = dma.done.wait [#allocation4], 2048  }
  0x39   :  { %2801 = vsyncadd [#allocation4], 4294965248 }
  0x3a   :  { %2802 = dma.done.wait [#allocation7], 10240  }
  0x3b   :  { %2803 = vsyncadd [#allocation7], 4294957056 }
  0x3c   :  { %2804 = dma.done.wait [#allocation10], 4096  }
  0x3d   :  { %2805 = vsyncadd [#allocation10], 4294963200  ;;  %v3973_v0 = vmov 0.0   ;;  %v122_v1 = vld [vmem:[#allocation3 + $0x68] sm:$0xff]  ;;  %v124_v2 = vld [vmem:[#allocation3 + $0x78] sm:$0xff]  ;;  %vm147_vm0 = vcmask 261120  }
  0x3e   :  { %236 = vmatprep.mubr.f32.mxu0 %v3973_v0  ;;  %349 = vmatprep.mubr.f32.mxu1 %v3973_v0  ;;  %v121_v3 = vld [vmem:[#allocation3 + $0x60] sm:$0xff]  ;;  %v123_v4 = vld [vmem:[#allocation3 + $0x70] sm:$0xff]  ;;  %v118_v5 = vld [vmem:[#allocation3 + $0x48] sm:$0xff]  ;;  %vm2818_vm1 = vmmov 0   ;;  %s2819_s10 = smov [#allocation12]  }
  0x3f   :  { %196 = vmatprep.subr.mxu0 %v122_v1  ;;  %309 = vmatprep.subr.mxu1 %v124_v2  ;;  %v120_v6 = vld [vmem:[#allocation3 + $0x58] sm:$0xff]  ;;  %v117_v7 = vld [vmem:[#allocation3 + $0x40] sm:$0xff]  ;;  %v119_v8 = vld [vmem:[#allocation3 + $0x50] sm:$0xff]  ;;  %s2295_s11 = sshll.u32 %s2819_s10, 4  ;;  %s2296_s11 = int_to_ptr.vmem [resolvable:$true] %s2295_s11 }
  0x40   :  { %197 = vmatpush1.msra.mxu0 %v121_v3  ;;  %310 = vmatpush1.msra.mxu1 %v123_v4  ;;  %v114_v9 = vld [vmem:[#allocation3 + $0x28] sm:$0xff]  ;;  %v116_v10 = vld [vmem:[#allocation3 + $0x38] sm:$0xff]  ;;  %v113_v11 = vld [vmem:[#allocation3 + $0x20] sm:$0xff]  ;;  %p2785_p12 = scmp.lt.s32.totalorder %s2296_s11, %s2296_s11 }
  0x41   :  { %198 = vmatprep.subr.mxu0 %v118_v5  ;;  %311 = vmatprep.subr.mxu1 %v120_v6  ;;  %v115_v12 = vld [vmem:[#allocation3 + $0x30] sm:$0xff]  ;;  %v110_v13 = vld [vmem:[#allocation3 + $0x8] sm:$0xff]  ;;  %v112_v14 = vld [vmem:[#allocation3 + $0x18] sm:$0xff] }
  0x42   :  { %199 = vmatpush1.msra.mxu0 %v117_v7  ;;  %312 = vmatpush1.msra.mxu1 %v119_v8  ;;  %v109_v15 = vld [vmem:[#allocation3] sm:$0xff]  ;;  %v111_v16 = vld [vmem:[#allocation3 + $0x10] sm:$0xff]  ;;  %v2905_v18 = vld [vmem:[#allocation8 + $0x1e8] sm:$0xff] }
  0x43   :  { %200 = vmatprep.subr.mxu0 %v114_v9  ;;  %313 = vmatprep.subr.mxu1 %v116_v10  ;;  %v101_v17 = vld [vmem:[%s3963_s0] sm:$0xff]  ;;  %4070 = vst [vmem:[#allocation17_spill] sm:$0xff] %v2905_v18  ;;  %v2907_v19 = vld [vmem:[#allocation8 + $0x1f8] sm:$0xff]  ;;  %v2911_v21 = vld [vmem:[#allocation8 + $0x1f0] sm:$0xff] }
  0x44   :  { %201 = vmatpush1.msra.mxu0 %v113_v11  ;;  %314 = vmatpush1.msra.mxu1 %v115_v12  ;;  %4071 = vst [vmem:[#allocation18_spill] sm:$0xff] %v2907_v19  ;;  %v2909_v20 = vld [vmem:[#allocation8 + $0x1e0] sm:$0xff]  ;;  %v2915_v22 = vld [vmem:[#allocation8 + $0x1c8] sm:$0xff]  ;;  %v2917_v23 = vld [vmem:[#allocation8 + $0x1d8] sm:$0xff] }
  0x45   :  { %202 = vmatprep.subr.mxu0 %v110_v13  ;;  %315 = vmatprep.subr.mxu1 %v112_v14  ;;  %v2923_v24 = vld [vmem:[#allocation8 + $0x1c0] sm:$0xff]  ;;  %v2925_v25 = vld [vmem:[#allocation8 + $0x1d0] sm:$0xff]  ;;  %v102_v26 = vld [vmem:[%s3963_s0 + $0x8] sm:$0xff] }
  0x46   :  { %203 = vmatpush1.msra.mxu0 %v109_v15  ;;  %316 = vmatpush1.msra.mxu1 %v111_v16  ;;  %v2934_v27 = vld [vmem:[#allocation8 + $0x1a8] sm:$0xff]  ;;  %v2936_v28 = vld [vmem:[#allocation8 + $0x1b8] sm:$0xff]  ;;  %v2940_v29 = vld [vmem:[#allocation8 + $0x1a0] sm:$0xff] }
  0x47   :  { %2306 = vmatmul.mubr.msk.f32.vlgmr.msra.gmra.mxu0 %vm147_vm0, %v101_v17  ;;  %2314 = vmatmul.mubr.msk.f32.vlgmr.msra.gmra.mxu1 %vm147_vm0, %v101_v17  ;;  %v2942_v30 = vld [vmem:[#allocation8 + $0x1b0] sm:$0xff]  ;;  %v2946_v31 = vld [vmem:[#allocation8 + $0x188] sm:$0xff]  ;;  %v2948_v32 = vld [vmem:[#allocation8 + $0x198] sm:$0xff] }
  0x48   :  { %498 = vmatprep.subr.mxu0 %v2905_v18  ;;  %569 = vmatprep.subr.mxu1 %v2907_v19  ;;  %v2954_v33 = vld [vmem:[#allocation8 + $0x180] sm:$0xff]  ;;  %v2956_v34 = vld [vmem:[#allocation8 + $0x190] sm:$0xff]  ;;  %v2965_v36 = vld [vmem:[#allocation8 + $0x168] sm:$0xff] }
  0x49   :  { %499 = vmatpush1.msra.mxu0 %v2909_v20  ;;  %570 = vmatpush1.msra.mxu1 %v2911_v21  ;;  %v103_v35 = vld [vmem:[%s3963_s0 + $0x10] sm:$0xff]  ;;  %v2967_v37 = vld [vmem:[#allocation8 + $0x178] sm:$0xff]  ;;  %v2971_v38 = vld [vmem:[#allocation8 + $0x160] sm:$0xff] }
  0x4a   :  { %500 = vmatprep.subr.mxu0 %v2915_v22  ;;  %571 = vmatprep.subr.mxu1 %v2917_v23  ;;  %v2973_v39 = vld [vmem:[#allocation8 + $0x170] sm:$0xff]  ;;  %v2977_v40 = vld [vmem:[#allocation8 + $0x148] sm:$0xff]  ;;  %v2979_v41 = vld [vmem:[#allocation8 + $0x158] sm:$0xff] }
  0x4b   :  { %242 = vmatprep.mubr.f32.mxu0 %v3973_v0  ;;  %355 = vmatprep.mubr.f32.mxu1 %v3973_v0  ;;  %v2985_v42 = vld [vmem:[#allocation8 + $0x140] sm:$0xff]  ;;  %v2987_v43 = vld [vmem:[#allocation8 + $0x150] sm:$0xff]  ;;  %v104_v44 = vld [vmem:[%s3963_s0 + $0x18] sm:$0xff] }
  0x4c   :  { %501 = vmatpush1.msra.mxu0 %v2923_v24  ;;  %572 = vmatpush1.msra.mxu1 %v2925_v25  ;;  %v2996_v45 = vld [vmem:[#allocation8 + $0x128] sm:$0xff]  ;;  %v2998_v46 = vld [vmem:[#allocation8 + $0x138] sm:$0xff]  ;;  %v3002_v47 = vld [vmem:[#allocation8 + $0x120] sm:$0xff] }
  0x4d   :  { %2307 = vmatmul.mubr.msk.f32.gmra.mxu0 %vm147_vm0, %v102_v26  ;;  %2315 = vmatmul.mubr.msk.f32.gmra.mxu1 %vm147_vm0, %v102_v26  ;;  %v3004_v48 = vld [vmem:[#allocation8 + $0x130] sm:$0xff]  ;;  %v3008_v49 = vld [vmem:[#allocation8 + $0x108] sm:$0xff]  ;;  %v3010_v50 = vld [vmem:[#allocation8 + $0x118] sm:$0xff] }
  0x4e   :  { %502 = vmatprep.subr.mxu0 %v2934_v27  ;;  %573 = vmatprep.subr.mxu1 %v2936_v28  ;;  %v3016_v51 = vld [vmem:[#allocation8 + $0x100] sm:$0xff]  ;;  %v3018_v52 = vld [vmem:[#allocation8 + $0x110] sm:$0xff]  ;;  %v3027_v54 = vld [vmem:[#allocation8 + $0xe8] sm:$0xff] }
  0x4f   :  { %503 = vmatpush1.msra.mxu0 %v2940_v29  ;;  %574 = vmatpush1.msra.mxu1 %v2942_v30  ;;  %v105_v53 = vld [vmem:[%s3963_s0 + $0x20] sm:$0xff]  ;;  %v3029_v55 = vld [vmem:[#allocation8 + $0xf8] sm:$0xff]  ;;  %v3035_v57 = vld [vmem:[#allocation8 + $0xf0] sm:$0xff] }
  0x50   :  { %504 = vmatprep.subr.mxu0 %v2946_v31  ;;  %575 = vmatprep.subr.mxu1 %v2948_v32  ;;  %v3033_v56 = vld [vmem:[#allocation8 + $0xe0] sm:$0xff]  ;;  %v3039_v58 = vld [vmem:[#allocation8 + $0xc8] sm:$0xff]  ;;  %v3041_v59 = vld [vmem:[#allocation8 + $0xd8] sm:$0xff] }
  0x51   :  { %248 = vmatprep.mubr.f32.mxu0 %v3973_v0  ;;  %361 = vmatprep.mubr.f32.mxu1 %v3973_v0  ;;  %v3047_v60 = vld [vmem:[#allocation8 + $0xc0] sm:$0xff]  ;;  %v3049_v61 = vld [vmem:[#allocation8 + $0xd0] sm:$0xff]  ;;  %v106_v62 = vld [vmem:[%s3963_s0 + $0x28] sm:$0xff] }
  0x52   :  { %505 = vmatpush1.msra.mxu0 %v2954_v33  ;;  %576 = vmatpush1.msra.mxu1 %v2956_v34  ;;  %v3058_v63 = vld [vmem:[#allocation8 + $0xa8] sm:$0xff]  ;;  %v3060_v1 = vld [vmem:[#allocation8 + $0xb8] sm:$0xff]  ;;  %v3064_v2 = vld [vmem:[#allocation8 + $0xa0] sm:$0xff] }
  0x53   :  { %2308 = vmatmul.mubr.msk.f32.gmra.mxu0 %vm147_vm0, %v103_v35  ;;  %2316 = vmatmul.mubr.msk.f32.gmra.mxu1 %vm147_vm0, %v103_v35  ;;  %v3066_v3 = vld [vmem:[#allocation8 + $0xb0] sm:$0xff]  ;;  %v3070_v4 = vld [vmem:[#allocation8 + $0x88] sm:$0xff]  ;;  %v3072_v5 = vld [vmem:[#allocation8 + $0x98] sm:$0xff] }
  0x54   :  { %506 = vmatprep.subr.mxu0 %v2965_v36  ;;  %577 = vmatprep.subr.mxu1 %v2967_v37  ;;  %4072 = vst [vmem:[#allocation19_spill] sm:$0xff] %v3066_v3  ;;  %4073 = vst [vmem:[#allocation20_spill] sm:$0xff] %v3070_v4  ;;  %v3078_v6 = vld [vmem:[#allocation8 + $0x80] sm:$0xff]  ;;  %v3080_v7 = vld [vmem:[#allocation8 + $0x90] sm:$0xff] }
  0x55   :  { %507 = vmatpush1.msra.mxu0 %v2971_v38  ;;  %578 = vmatpush1.msra.mxu1 %v2973_v39  ;;  %4074 = vst [vmem:[#allocation21_spill] sm:$0xff] %v3072_v5  ;;  %4075 = vst [vmem:[#allocation22_spill] sm:$0xff] %v3078_v6  ;;  %v107_v8 = vld [vmem:[%s3963_s0 + $0x30] sm:$0xff]  ;;  %v3089_v9 = vld [vmem:[#allocation8 + $0x68] sm:$0xff] }
  0x56   :  { %508 = vmatprep.subr.mxu0 %v2977_v40  ;;  %579 = vmatprep.subr.mxu1 %v2979_v41  ;;  %4076 = vst [vmem:[#allocation23_spill] sm:$0xff] %v3080_v7  ;;  %4077 = vst [vmem:[#allocation24_spill] sm:$0xff] %v3089_v9  ;;  %v3091_v10 = vld [vmem:[#allocation8 + $0x78] sm:$0xff]  ;;  %v3095_v11 = vld [vmem:[#allocation8 + $0x60] sm:$0xff] }
  0x57   :  { %254 = vmatprep.mubr.f32.mxu0 %v3973_v0  ;;  %367 = vmatprep.mubr.f32.mxu1 %v3973_v0  ;;  %4078 = vst [vmem:[#allocation25_spill] sm:$0xff] %v3091_v10  ;;  %4079 = vst [vmem:[#allocation26_spill] sm:$0xff] %v3095_v11  ;;  %v3097_v12 = vld [vmem:[#allocation8 + $0x70] sm:$0xff]  ;;  %v3101_v13 = vld [vmem:[#allocation8 + $0x48] sm:$0xff] }
  0x58   :  { %509 = vmatpush1.msra.mxu0 %v2985_v42  ;;  %580 = vmatpush1.msra.mxu1 %v2987_v43  ;;  %4080 = vst [vmem:[#allocation27_spill] sm:$0xff] %v3097_v12  ;;  %4081 = vst [vmem:[#allocation28_spill] sm:$0xff] %v3101_v13  ;;  %v3103_v14 = vld [vmem:[#allocation8 + $0x58] sm:$0xff]  ;;  %v3109_v15 = vld [vmem:[#allocation8 + $0x40] sm:$0xff] }
  0x59   :  { %2309 = vmatmul.mubr.msk.f32.gmra.mxu0 %vm147_vm0, %v104_v44  ;;  %2317 = vmatmul.mubr.msk.f32.gmra.mxu1 %vm147_vm0, %v104_v44  ;;  %4082 = vst [vmem:[#allocation29_spill] sm:$0xff] %v3103_v14  ;;  %4083 = vst [vmem:[#allocation30_spill] sm:$0xff] %v3109_v15  ;;  %v3111_v16 = vld [vmem:[#allocation8 + $0x50] sm:$0xff]  ;;  %v108_v17 = vld [vmem:[%s3963_s0 + $0x38] sm:$0xff] }
  0x5a   :  { %510 = vmatprep.subr.mxu0 %v2996_v45  ;;  %581 = vmatprep.subr.mxu1 %v2998_v46  ;;  %4084 = vst [vmem:[#allocation31_spill] sm:$0xff] %v3111_v16  ;;  %v3120_v26 = vld [vmem:[#allocation8 + $0x28] sm:$0xff]  ;;  %v3122_v35 = vld [vmem:[#allocation8 + $0x38] sm:$0xff]  ;;  %v3126_v44 = vld [vmem:[#allocation8 + $0x20] sm:$0xff] }
  0x5b   :  { %511 = vmatpush1.msra.mxu0 %v3002_v47  ;;  %582 = vmatpush1.msra.mxu1 %v3004_v48  ;;  %4085 = vst [vmem:[#allocation32_spill] sm:$0xff] %v3120_v26  ;;  %4086 = vst [vmem:[#allocation33_spill] sm:$0xff] %v3122_v35 }
  0x5c   :  { %512 = vmatprep.subr.mxu0 %v3008_v49  ;;  %583 = vmatprep.subr.mxu1 %v3010_v50  ;;  %4087 = vst [vmem:[#allocation34_spill] sm:$0xff] %v3126_v44 }
  0x5d   :  { %260 = vmatprep.mubr.f32.mxu0 %v3973_v0  ;;  %373 = vmatprep.mubr.f32.mxu1 %v3973_v0 }
  0x5e   :  { %513 = vmatpush1.msra.mxu0 %v3016_v51  ;;  %584 = vmatpush1.msra.mxu1 %v3018_v52 }
  0x5f   :  { %2310 = vmatmul.mubr.msk.f32.gmra.mxu0 %vm147_vm0, %v105_v53  ;;  %2318 = vmatmul.mubr.msk.f32.gmra.mxu1 %vm147_vm0, %v105_v53  ;;  %v3128_v53 = vld [vmem:[#allocation8 + $0x30] sm:$0xff] }
  0x60   :  { %514 = vmatprep.subr.mxu0 %v3027_v54  ;;  %585 = vmatprep.subr.mxu1 %v3029_v55  ;;  %4088 = vst [vmem:[#allocation35_spill] sm:$0xff] %v3128_v53 }
  0x61   :  { %515 = vmatpush1.msra.mxu0 %v3033_v56  ;;  %586 = vmatpush1.msra.mxu1 %v3035_v57 }
  0x62   :  { %516 = vmatprep.subr.mxu0 %v3039_v58  ;;  %587 = vmatprep.subr.mxu1 %v3041_v59 }
  0x63   :  { %266 = vmatprep.mubr.f32.mxu0 %v3973_v0  ;;  %379 = vmatprep.mubr.f32.mxu1 %v3973_v0 }
  0x64   :  { %517 = vmatpush1.msra.mxu0 %v3047_v60  ;;  %588 = vmatpush1.msra.mxu1 %v3049_v61 }
  0x65   :  { %2311 = vmatmul.mubr.msk.f32.gmra.mxu0 %vm147_vm0, %v106_v62  ;;  %2319 = vmatmul.mubr.msk.f32.gmra.mxu1 %vm147_vm0, %v106_v62  ;;  %v3132_v62 = vld [vmem:[#allocation8 + $0x8] sm:$0xff] }
  0x66   :  { %518 = vmatprep.subr.mxu0 %v3058_v63  ;;  %589 = vmatprep.subr.mxu1 %v3060_v1  ;;  %4089 = vst [vmem:[#allocation36_spill] sm:$0xff] %v3132_v62 }
  0x67   :  { %519 = vmatpush1.msra.mxu0 %v3064_v2  ;;  %590 = vmatpush1.msra.mxu1 %v3066_v3 }
  0x68   :  { %520 = vmatprep.subr.mxu0 %v3070_v4  ;;  %591 = vmatprep.subr.mxu1 %v3072_v5 }
  0x69   :  { %272 = vmatprep.mubr.f32.mxu0 %v3973_v0  ;;  %385 = vmatprep.mubr.f32.mxu1 %v3973_v0 }
  0x6a   :  { %521 = vmatpush1.msra.mxu0 %v3078_v6  ;;  %592 = vmatpush1.msra.mxu1 %v3080_v7 }
  0x6b   :  { %2312 = vmatmul.mubr.msk.f32.gmra.mxu0 %vm147_vm0, %v107_v8  ;;  %2320 = vmatmul.mubr.msk.f32.gmra.mxu1 %vm147_vm0, %v107_v8  ;;  %v3134_v8 = vld [vmem:[#allocation8 + $0x18] sm:$0xff] }
  0x6c   :  { %522 = vmatprep.subr.mxu0 %v3089_v9  ;;  %593 = vmatprep.subr.mxu1 %v3091_v10  ;;  %4090 = vst [vmem:[#allocation37_spill] sm:$0xff] %v3134_v8 }
  0x6d   :  { %523 = vmatpush1.msra.mxu0 %v3095_v11  ;;  %594 = vmatpush1.msra.mxu1 %v3097_v12 }
  0x6e   :  { %524 = vmatprep.subr.mxu0 %v3101_v13  ;;  %595 = vmatprep.subr.mxu1 %v3103_v14 }
  0x6f   :  { %278 = vmatprep.mubr.f32.mxu0 %v3973_v0  ;;  %391 = vmatprep.mubr.f32.mxu1 %v3973_v0  ;;  %v3138_v0 = vld [vmem:[#allocation8] sm:$0xff] }
  0x70   :  { %525 = vmatpush1.msra.mxu0 %v3109_v15  ;;  %596 = vmatpush1.msra.mxu1 %v3111_v16  ;;  %4091 = vst [vmem:[#allocation38_spill] sm:$0xff] %v3138_v0  ;;  %v3142_v16 = vld [vmem:[#allocation8 + $0x10] sm:$0xff] }
  0x71   :  { %2313 = vmatmul.mubr.msk.f32.gmra.mxu0 %vm147_vm0, %v108_v17  ;;  %2321 = vmatmul.mubr.msk.f32.gmra.mxu1 %vm147_vm0, %v108_v17  ;;  %4092 = vst [vmem:[#allocation39_spill] sm:$0xff] %v3142_v16  ;;  %v4093_v17 = vmov 0.0  }
  0x72   :  { %526 = vmatprep.subr.mxu0 %v3120_v26  ;;  %597 = vmatprep.subr.mxu1 %v3122_v35 }
  0x73   :  { %527 = vmatpush1.msra.mxu0 %v3126_v44  ;;  %598 = vmatpush1.msra.mxu1 %v3128_v53 }
  0x74   :  { %528 = vmatprep.subr.mxu0 %v3132_v62  ;;  %599 = vmatprep.subr.mxu1 %v3134_v8 }
  0x75   :  { %529 = vmatpush1.msra.mxu0 %v3138_v0  ;;  %562 = vmatprep.mubr.f32.mxu0 %v4093_v17 }
  0x76   :  { %600 = vmatpush1.msra.mxu1 %v3142_v16  ;;  %633 = vmatprep.mubr.f32.mxu1 %v4093_v17 }
  0x77   :  { %563 = vmatmul.mubr.f32.vlgmr.msra.gmra.mxu0 %v4093_v17  ;;  %634 = vmatmul.mubr.f32.vlgmr.msra.gmra.mxu1 %v4093_v17 }
  0x78   :  { %672 = vmatprep.subr.mxu0 %v2905_v18  ;;  %743 = vmatprep.subr.mxu1 %v2907_v19 }
  0x79   :  { %673 = vmatpush1.msra.mxu0 %v2909_v20  ;;  %744 = vmatpush1.msra.mxu1 %v2911_v21 }
  0x7a   :  { %674 = vmatprep.subr.mxu0 %v2915_v22  ;;  %745 = vmatprep.subr.mxu1 %v2917_v23 }
  0x7b   :  { %675 = vmatpush1.msra.mxu0 %v2923_v24  ;;  %746 = vmatpush1.msra.mxu1 %v2925_v25 }
  0x7c   :  { %676 = vmatprep.subr.mxu0 %v2934_v27  ;;  %747 = vmatprep.subr.mxu1 %v2936_v28 }
  0x7d   :  { %677 = vmatpush1.msra.mxu0 %v2940_v29  ;;  %748 = vmatpush1.msra.mxu1 %v2942_v30 }
  0x7e   :  { %678 = vmatprep.subr.mxu0 %v2946_v31  ;;  %749 = vmatprep.subr.mxu1 %v2948_v32 }
  0x7f   :  { %679 = vmatpush1.msra.mxu0 %v2954_v33  ;;  %750 = vmatpush1.msra.mxu1 %v2956_v34 }
  0x80   :  { %680 = vmatprep.subr.mxu0 %v2965_v36  ;;  %751 = vmatprep.subr.mxu1 %v2967_v37 }
  0x81   :  { %681 = vmatpush1.msra.mxu0 %v2971_v38  ;;  %752 = vmatpush1.msra.mxu1 %v2973_v39 }
  0x82   :  { %682 = vmatprep.subr.mxu0 %v2977_v40  ;;  %753 = vmatprep.subr.mxu1 %v2979_v41 }
  0x83   :  { %683 = vmatpush1.msra.mxu0 %v2985_v42  ;;  %754 = vmatpush1.msra.mxu1 %v2987_v43 }
  0x84   :  { %684 = vmatprep.subr.mxu0 %v2996_v45  ;;  %755 = vmatprep.subr.mxu1 %v2998_v46 }
  0x85   :  { %685 = vmatpush1.msra.mxu0 %v3002_v47  ;;  %756 = vmatpush1.msra.mxu1 %v3004_v48 }
  0x86   :  { %686 = vmatprep.subr.mxu0 %v3008_v49  ;;  %757 = vmatprep.subr.mxu1 %v3010_v50 }
  0x87   :  { %687 = vmatpush1.msra.mxu0 %v3016_v51  ;;  %758 = vmatpush1.msra.mxu1 %v3018_v52 }
  0x88   :  { %688 = vmatprep.subr.mxu0 %v3027_v54  ;;  %759 = vmatprep.subr.mxu1 %v3029_v55 }
  0x89   :  { %689 = vmatpush1.msra.mxu0 %v3033_v56  ;;  %760 = vmatpush1.msra.mxu1 %v3035_v57 }
  0x8a   :  { %690 = vmatprep.subr.mxu0 %v3039_v58  ;;  %761 = vmatprep.subr.mxu1 %v3041_v59 }
  0x8b   :  { %691 = vmatpush1.msra.mxu0 %v3047_v60  ;;  %762 = vmatpush1.msra.mxu1 %v3049_v61 }
  0x8c   :  { %692 = vmatprep.subr.mxu0 %v3058_v63  ;;  %763 = vmatprep.subr.mxu1 %v3060_v1 }
  0x8d   :  { %693 = vmatpush1.msra.mxu0 %v3064_v2  ;;  %764 = vmatpush1.msra.mxu1 %v3066_v3 }
  0x8e   :  { %694 = vmatprep.subr.mxu0 %v3070_v4  ;;  %765 = vmatprep.subr.mxu1 %v3072_v5  ;;  %v4094_v4 = vld [vmem:[#allocation31_spill] sm:$0xff] }
  0x8f   :  { %695 = vmatpush1.msra.mxu0 %v3078_v6  ;;  %766 = vmatpush1.msra.mxu1 %v3080_v7 }
  0x90   :  { %696 = vmatprep.subr.mxu0 %v3089_v9  ;;  %767 = vmatprep.subr.mxu1 %v3091_v10 }
  0x91   :  { %697 = vmatpush1.msra.mxu0 %v3095_v11  ;;  %768 = vmatpush1.msra.mxu1 %v3097_v12 }
  0x92   :  { %698 = vmatprep.subr.mxu0 %v3101_v13  ;;  %769 = vmatprep.subr.mxu1 %v3103_v14 }
  0x93   :  { %699 = vmatpush1.msra.mxu0 %v3109_v15  ;;  %770 = vmatpush1.msra.mxu1 %v4094_v4 }
  0x94   :  { %700 = vmatprep.subr.mxu0 %v3120_v26  ;;  %771 = vmatprep.subr.mxu1 %v3122_v35  ;;  %v3996_v35 = vlaneseq }
  0x95   :  { %701 = vmatpush1.msra.mxu0 %v3126_v44  ;;  %772 = vmatpush1.msra.mxu1 %v3128_v53 }
  0x96   :  { %702 = vmatprep.subr.mxu0 %v3132_v62  ;;  %773 = vmatprep.subr.mxu1 %v3134_v8  ;;  %v3221_v44 = vshrl.u32 %v3996_v35, 7 }
  0x97   :  { %703 = vmatpush1.msra.mxu0 %v3138_v0  ;;  %736 = vmatprep.mubr.f32.mxu0 %v4093_v17 }
  0x98   :  { %774 = vmatpush1.msra.mxu1 %v3142_v16  ;;  %807 = vmatprep.mubr.f32.mxu1 %v4093_v17  ;;  %4095 = vst [vmem:[#allocation40_spill] sm:$0xff] %v3221_v44  ;;  %v4013_v0 = vsub.s32 0, %v3221_v44  ;;  %v4016_v8 = vsub.s32 2, %v3221_v44  ;;  %v125_v16 = vld [vmem:[%s3965_s2] sm:$0xf]  ;;  %v4024_v35 = vsub.s32 3, %v3221_v44 }
  0x99   :  { %846 = vmatprep.subr.mxu0 %v2905_v18  ;;  %917 = vmatprep.subr.mxu1 %v2907_v19  ;;  %v4023_v19 = vsub.s32 1, %v3221_v44 }
  0x9a   :  { %v130_v26 = vrot.slane %v125_v16, %v4013_v0  ;;  %v3242_v4 = vrot.slane %v125_v16, %v4016_v8  ;;  %v3248_v12 = vrot.slane %v125_v16, %v4024_v35 }
  0x9b   :  { %v134_v13 = vrot.slane %v125_v16, %v4023_v19 }
 0x107   :  { %v3223_v53 = vpop.f32.mrf.mxu0  ;;  %v3225_v62 = vpop.f32.mrf.mxu1 }
 0x109   :  { %v3232_v17 = vpop.f32.mrf.mxu0  ;;  %v3234_v18 = vpop.f32.mrf.mxu1 }
 0x10d   :  { %v244_v15 = vpop.f32.mrf.mxu0  ;;  %v357_v14 = vpop.f32.mrf.mxu1 }
 0x10e   :  { %v3250_v11 = vadd.f32 %v244_v15, %v130_v26  ;;  %v3253_v10 = vadd.f32 %v357_v14, %v3242_v4 }
 0x10f   :  { %v246_v9 = vpop.f32.mrf.mxu0  ;;  %v359_v0 = vpop.f32.mrf.mxu1 }
 0x110   :  { %4096 = vst [vmem:[#allocation41_spill] sm:$0xff] %v3253_v10  ;;  %v3255_v7 = vadd.f32 %v246_v9, %v134_v13  ;;  %v3258_v8 = vadd.f32 %v359_v0, %v3248_v12 }
 0x112   :  { %4097 = vst [vmem:[#allocation42_spill] sm:$0xff] %v3255_v7  ;;  %4098 = vst [vmem:[#allocation43_spill] sm:$0xff] %v3258_v8 }
 0x113   :  { %v250_v6 = vpop.f32.mrf.mxu0  ;;  %v363_v5 = vpop.f32.mrf.mxu1 }
 0x114   :  { %v3260_v3 = vadd.f32 %v250_v6, %v130_v26  ;;  %v3263_v19 = vadd.f32 %v363_v5, %v3242_v4 }
 0x115   :  { %v252_v16 = vpop.f32.mrf.mxu0  ;;  %v365_v15 = vpop.f32.mrf.mxu1 }
 0x116   :  { %4099 = vst [vmem:[#allocation44_spill] sm:$0xff] %v3260_v3  ;;  %4100 = vst [vmem:[#allocation45_spill] sm:$0xff] %v3263_v19  ;;  %v3265_v35 = vadd.f32 %v252_v16, %v134_v13  ;;  %v3268_v14 = vadd.f32 %v365_v15, %v3248_v12 }
 0x118   :  { %4101 = vst [vmem:[#allocation46_spill] sm:$0xff] %v3265_v35  ;;  %4102 = vst [vmem:[#allocation47_spill] sm:$0xff] %v3268_v14 }
 0x119   :  { %v256_v44 = vpop.f32.mrf.mxu0  ;;  %v369_v9 = vpop.f32.mrf.mxu1 }
 0x11a   :  { %v3270_v10 = vadd.f32 %v256_v44, %v130_v26  ;;  %v3273_v0 = vadd.f32 %v369_v9, %v3242_v4 }
 0x11b   :  { %v258_v8 = vpop.f32.mrf.mxu0  ;;  %v371_v6 = vpop.f32.mrf.mxu1 }
 0x11c   :  { %4103 = vst [vmem:[#allocation48_spill] sm:$0xff] %v3270_v10  ;;  %4104 = vst [vmem:[#allocation49_spill] sm:$0xff] %v3273_v0  ;;  %v3275_v3 = vadd.f32 %v258_v8, %v134_v13  ;;  %v3278_v5 = vadd.f32 %v371_v6, %v3248_v12 }
 0x11e   :  { %4105 = vst [vmem:[#allocation50_spill] sm:$0xff] %v3275_v3  ;;  %4106 = vst [vmem:[#allocation51_spill] sm:$0xff] %v3278_v5 }
 0x11f   :  { %v262_v19 = vpop.f32.mrf.mxu0  ;;  %v375_v16 = vpop.f32.mrf.mxu1 }
 0x120   :  { %v3280_v35 = vadd.f32 %v262_v19, %v130_v26  ;;  %v3283_v15 = vadd.f32 %v375_v16, %v3242_v4 }
 0x121   :  { %v264_v14 = vpop.f32.mrf.mxu0  ;;  %v377_v44 = vpop.f32.mrf.mxu1 }
 0x122   :  { %4107 = vst [vmem:[#allocation52_spill] sm:$0xff] %v3280_v35  ;;  %4108 = vst [vmem:[#allocation53_spill] sm:$0xff] %v3283_v15  ;;  %v3285_v10 = vadd.f32 %v264_v14, %v134_v13  ;;  %v3288_v9 = vadd.f32 %v377_v44, %v3248_v12 }
 0x124   :  { %4109 = vst [vmem:[#allocation54_spill] sm:$0xff] %v3285_v10  ;;  %4110 = vst [vmem:[#allocation55_spill] sm:$0xff] %v3288_v9 }
 0x125   :  { %v268_v0 = vpop.f32.mrf.mxu0  ;;  %v381_v8 = vpop.f32.mrf.mxu1 }
 0x126   :  { %v3290_v3 = vadd.f32 %v268_v0, %v130_v26  ;;  %v3293_v6 = vadd.f32 %v381_v8, %v3242_v4 }
 0x127   :  { %v270_v5 = vpop.f32.mrf.mxu0  ;;  %v383_v19 = vpop.f32.mrf.mxu1 }
 0x128   :  { %4111 = vst [vmem:[#allocation56_spill] sm:$0xff] %v3290_v3  ;;  %4112 = vst [vmem:[#allocation57_spill] sm:$0xff] %v3293_v6  ;;  %v3295_v35 = vadd.f32 %v270_v5, %v134_v13  ;;  %v3298_v16 = vadd.f32 %v383_v19, %v3248_v12 }
 0x12a   :  { %4113 = vst [vmem:[#allocation58_spill] sm:$0xff] %v3295_v35  ;;  %4114 = vst [vmem:[#allocation59_spill] sm:$0xff] %v3298_v16 }
 0x12b   :  { %v274_v15 = vpop.f32.mrf.mxu0  ;;  %v387_v14 = vpop.f32.mrf.mxu1 }
 0x12c   :  { %v3300_v10 = vadd.f32 %v274_v15, %v130_v26  ;;  %v3303_v44 = vadd.f32 %v387_v14, %v3242_v4 }
 0x12d   :  { %v276_v9 = vpop.f32.mrf.mxu0  ;;  %v389_v0 = vpop.f32.mrf.mxu1 }
 0x12e   :  { %4115 = vst [vmem:[#allocation60_spill] sm:$0xff] %v3300_v10  ;;  %4116 = vst [vmem:[#allocation61_spill] sm:$0xff] %v3303_v44  ;;  %v3305_v3 = vadd.f32 %v276_v9, %v134_v13  ;;  %v3308_v8 = vadd.f32 %v389_v0, %v3248_v12  ;;  %v239_v9 = vadd.f32 %v3223_v53, %v130_v26 }
 0x12f   :  { %v241_v0 = vadd.f32 %v3232_v17, %v134_v13 }
 0x130   :  { %4117 = vst [vmem:[#allocation62_spill] sm:$0xff] %v3305_v3  ;;  %4118 = vst [vmem:[#allocation63_spill] sm:$0xff] %v3308_v8 }
 0x131   :  { %v280_v6 = vpop.f32.mrf.mxu0  ;;  %v393_v5 = vpop.f32.mrf.mxu1 }
 0x132   :  { %v3310_v35 = vadd.f32 %v280_v6, %v130_v26  ;;  %v3313_v19 = vadd.f32 %v393_v5, %v3242_v4 }
 0x133   :  { %v282_v16 = vpop.f32.mrf.mxu0  ;;  %v395_v15 = vpop.f32.mrf.mxu1 }
 0x134   :  { %4119 = vst [vmem:[#allocation64_spill] sm:$0xff] %v3310_v35  ;;  %4120 = vst [vmem:[#allocation65_spill] sm:$0xff] %v3313_v19  ;;  %v3315_v10 = vadd.f32 %v282_v16, %v134_v13  ;;  %v3318_v14 = vadd.f32 %v395_v15, %v3248_v12  ;;  %v354_v16 = vadd.f32 %v3234_v18, %v3248_v12 }
 0x135   :  { %v352_v15 = vadd.f32 %v3225_v62, %v3242_v4  ;;  %v4123_v62 = vld [vmem:[#allocation19_spill] sm:$0xff] }
 0x136   :  { %4121 = vst [vmem:[#allocation66_spill] sm:$0xff] %v3315_v10  ;;  %4122 = vst [vmem:[#allocation67_spill] sm:$0xff] %v3318_v14 }
 0x137   :  { %v564_v44 = vpop.f32.mrf.mxu0  ;;  %v635_v35 = vpop.f32.mrf.mxu1 }
 0x138   :  { %v640_v8 = vadd.f32 %v564_v44, %v239_v9  ;;  %v642_v14 = vadd.f32 %v635_v35, %v352_v15  ;;  %v4128_v15 = vld [vmem:[#allocation24_spill] sm:$0xff] }
 0x139   :  { %v566_v3 = vpop.f32.mrf.mxu0  ;;  %v637_v19 = vpop.f32.mrf.mxu1 }
 0x13a   :  { %v2322_v7 = vmul.f32 -1.442695, %v640_v8  ;;  %v641_v6 = vadd.f32 %v566_v3, %v241_v0  ;;  %v643_v10 = vadd.f32 %v637_v19, %v354_v16  ;;  %v4127_v16 = vld [vmem:[#allocation23_spill] sm:$0xff] }
 0x13c   :  { %2468 = vpow2.f32 %v2322_v7  ;;  %v2323_v5 = vmul.f32 -1.442695, %v641_v6  ;;  %v2324_v26 = vmul.f32 -1.442695, %v643_v10  ;;  %v4125_v6 = vld [vmem:[#allocation21_spill] sm:$0xff] }
 0x13e   :  { %2470 = vpow2.f32 %v2323_v5  ;;  %v4126_v5 = vld [vmem:[#allocation22_spill] sm:$0xff] }
 0x13f   :  { %2472 = vpow2.f32 %v2324_v26  ;;  %v4129_v26 = vld [vmem:[#allocation25_spill] sm:$0xff] }
 0x149   :  { %v2469_v53 = vpop.eup %2468 }
 0x14a   :  { %v647_v13 = vadd.f32 1.0, %v2469_v53  ;;  %v4130_v53 = vld [vmem:[#allocation26_spill] sm:$0xff] }
 0x14b   :  { %v2471_v17 = vpop.eup %2470 }
 0x14c   :  { %2474 = vrcp.f32 %v647_v13  ;;  %v653_v3 = vadd.f32 1.0, %v2471_v17  ;;  %v2473_v7 = vpop.eup %2472  ;;  %v4131_v13 = vld [vmem:[#allocation27_spill] sm:$0xff]  ;;  %v4132_v17 = vld [vmem:[#allocation28_spill] sm:$0xff] }
 0x14d   :  { %2476 = vtanh.f32 %v642_v14  ;;  %v660_v0 = vadd.f32 1.0, %v2473_v7  ;;  %v4124_v14 = vld [vmem:[#allocation20_spill] sm:$0xff]  ;;  %v4134_v7 = vld [vmem:[#allocation30_spill] sm:$0xff] }
 0x14e   :  { %2478 = vrcp.f32 %v653_v3  ;;  %v4133_v3 = vld [vmem:[#allocation29_spill] sm:$0xff] }
 0x14f   :  { %2480 = vrcp.f32 %v660_v0  ;;  %v4138_v0 = vld [vmem:[#allocation34_spill] sm:$0xff] }
 0x159   :  { %v2475_v44 = vpop.eup %2474 }
 0x15a   :  { %v2477_v8 = vpop.eup %2476 }
 0x15b   :  { %v2479_v9 = vpop.eup %2478  ;;  %v664_v12 = vmul.f32 %v2477_v8, %v2475_v44  ;;  %v4135_v44 = vld [vmem:[#allocation31_spill] sm:$0xff]  ;;  %v4136_v8 = vld [vmem:[#allocation32_spill] sm:$0xff] }
 0x15c   :  { %v663_v18 = vmul.f32 0.0, %v2479_v9  ;;  %v2481_v4 = vpop.eup %2480  ;;  %v4137_v9 = vld [vmem:[#allocation33_spill] sm:$0xff] }
 0x15e   :  { %v3326_v19 = vadd.f32 %v664_v12, %v663_v18  ;;  %v4139_v18 = vld [vmem:[#allocation35_spill] sm:$0xff]  ;;  %v4140_v12 = vld [vmem:[#allocation36_spill] sm:$0xff] }
 0x160   :  { %2482 = vtanh.f32 %v3326_v19 }
 0x16d   :  { %v2483_v10 = vpop.eup %2482 }
 0x16e   :  { %v667_v35 = vmul.f32 %v2483_v10, %v2481_v4  ;;  %v4141_v4 = vld [vmem:[#allocation37_spill] sm:$0xff]  ;;  %v4142_v10 = vld [vmem:[#allocation38_spill] sm:$0xff] }
 0x170   :  { %737 = vmatmul.mubr.f32.vlgmr.msra.gmra.mxu0 %v667_v35  ;;  %808 = vmatmul.mubr.f32.vlgmr.msra.gmra.mxu1 %v667_v35  ;;  %v4143_v35 = vmov 0.0  }
 0x171   :  { %847 = vmatpush1.msra.mxu0 %v2909_v20  ;;  %918 = vmatpush1.msra.mxu1 %v2911_v21 }
 0x172   :  { %848 = vmatprep.subr.mxu0 %v2915_v22  ;;  %919 = vmatprep.subr.mxu1 %v2917_v23 }
 0x173   :  { %849 = vmatpush1.msra.mxu0 %v2923_v24  ;;  %920 = vmatpush1.msra.mxu1 %v2925_v25 }
 0x174   :  { %850 = vmatprep.subr.mxu0 %v2934_v27  ;;  %921 = vmatprep.subr.mxu1 %v2936_v28 }
 0x175   :  { %851 = vmatpush1.msra.mxu0 %v2940_v29  ;;  %922 = vmatpush1.msra.mxu1 %v2942_v30 }
 0x176   :  { %852 = vmatprep.subr.mxu0 %v2946_v31  ;;  %923 = vmatprep.subr.mxu1 %v2948_v32 }
 0x177   :  { %853 = vmatpush1.msra.mxu0 %v2954_v33  ;;  %924 = vmatpush1.msra.mxu1 %v2956_v34 }
 0x178   :  { %854 = vmatprep.subr.mxu0 %v2965_v36  ;;  %925 = vmatprep.subr.mxu1 %v2967_v37 }
 0x179   :  { %855 = vmatpush1.msra.mxu0 %v2971_v38  ;;  %926 = vmatpush1.msra.mxu1 %v2973_v39 }
 0x17a   :  { %856 = vmatprep.subr.mxu0 %v2977_v40  ;;  %927 = vmatprep.subr.mxu1 %v2979_v41 }
 0x17b   :  { %857 = vmatpush1.msra.mxu0 %v2985_v42  ;;  %928 = vmatpush1.msra.mxu1 %v2987_v43 }
 0x17c   :  { %858 = vmatprep.subr.mxu0 %v2996_v45  ;;  %929 = vmatprep.subr.mxu1 %v2998_v46 }
 0x17d   :  { %859 = vmatpush1.msra.mxu0 %v3002_v47  ;;  %930 = vmatpush1.msra.mxu1 %v3004_v48 }
 0x17e   :  { %860 = vmatprep.subr.mxu0 %v3008_v49  ;;  %931 = vmatprep.subr.mxu1 %v3010_v50 }
 0x17f   :  { %861 = vmatpush1.msra.mxu0 %v3016_v51  ;;  %932 = vmatpush1.msra.mxu1 %v3018_v52 }
 0x180   :  { %862 = vmatprep.subr.mxu0 %v3027_v54  ;;  %933 = vmatprep.subr.mxu1 %v3029_v55 }
 0x181   :  { %863 = vmatpush1.msra.mxu0 %v3033_v56  ;;  %934 = vmatpush1.msra.mxu1 %v3035_v57 }
 0x182   :  { %864 = vmatprep.subr.mxu0 %v3039_v58  ;;  %935 = vmatprep.subr.mxu1 %v3041_v59 }
 0x183   :  { %865 = vmatpush1.msra.mxu0 %v3047_v60  ;;  %936 = vmatpush1.msra.mxu1 %v3049_v61 }
 0x184   :  { %866 = vmatprep.subr.mxu0 %v3058_v63  ;;  %937 = vmatprep.subr.mxu1 %v3060_v1 }
 0x185   :  { %867 = vmatpush1.msra.mxu0 %v3064_v2  ;;  %938 = vmatpush1.msra.mxu1 %v4123_v62 }
 0x186   :  { %868 = vmatprep.subr.mxu0 %v4124_v14  ;;  %939 = vmatprep.subr.mxu1 %v4125_v6 }
 0x187   :  { %869 = vmatpush1.msra.mxu0 %v4126_v5  ;;  %940 = vmatpush1.msra.mxu1 %v4127_v16 }
 0x188   :  { %870 = vmatprep.subr.mxu0 %v4128_v15  ;;  %941 = vmatprep.subr.mxu1 %v4129_v26  ;;  %v4149_v26 = vld [vmem:[#allocation41_spill] sm:$0xff] }
 0x189   :  { %871 = vmatpush1.msra.mxu0 %v4130_v53  ;;  %942 = vmatpush1.msra.mxu1 %v4131_v13  ;;  %v4148_v53 = vld [vmem:[#allocation43_spill] sm:$0xff] }
 0x18a   :  { %872 = vmatprep.subr.mxu0 %v4132_v17  ;;  %943 = vmatprep.subr.mxu1 %v4133_v3  ;;  %v4144_v3 = vld [vmem:[#allocation39_spill] sm:$0xff] }
 0x18b   :  { %873 = vmatpush1.msra.mxu0 %v4134_v7  ;;  %944 = vmatpush1.msra.mxu1 %v4135_v44  ;;  %v4145_v44 = vld [vmem:[#allocation17_spill] sm:$0xff] }
 0x18c   :  { %874 = vmatprep.subr.mxu0 %v4136_v8  ;;  %945 = vmatprep.subr.mxu1 %v4137_v9  ;;  %v4146_v8 = vld [vmem:[#allocation18_spill] sm:$0xff] }
 0x18d   :  { %875 = vmatpush1.msra.mxu0 %v4138_v0  ;;  %946 = vmatpush1.msra.mxu1 %v4139_v18 }
 0x18e   :  { %876 = vmatprep.subr.mxu0 %v4140_v12  ;;  %947 = vmatprep.subr.mxu1 %v4141_v4  ;;  %v4147_v12 = vld [vmem:[#allocation42_spill] sm:$0xff] }
 0x18f   :  { %877 = vmatpush1.msra.mxu0 %v4142_v10  ;;  %910 = vmatprep.mubr.f32.mxu0 %v4143_v35 }
 0x190   :  { %948 = vmatpush1.msra.mxu1 %v4144_v3  ;;  %981 = vmatprep.mubr.f32.mxu1 %v4143_v35 }
 0x191   :  { %1020 = vmatprep.subr.mxu0 %v4145_v44  ;;  %1091 = vmatprep.subr.mxu1 %v4146_v8 }
 0x230   :  { %v738_v9 = vpop.f32.mrf.mxu0  ;;  %v809_v4 = vpop.f32.mrf.mxu1 }
 0x231   :  { %v814_v0 = vadd.f32 %v738_v9, %v3250_v11  ;;  %v816_v35 = vadd.f32 %v809_v4, %v4149_v26 }
 0x232   :  { %v740_v18 = vpop.f32.mrf.mxu0  ;;  %v811_v13 = vpop.f32.mrf.mxu1 }
 0x233   :  { %v2325_v7 = vmul.f32 -1.442695, %v814_v0  ;;  %v815_v17 = vadd.f32 %v740_v18, %v4147_v12  ;;  %v817_v3 = vadd.f32 %v811_v13, %v4148_v53 }
 0x235   :  { %2484 = vpow2.f32 %v2325_v7  ;;  %v2326_v10 = vmul.f32 -1.442695, %v815_v17  ;;  %v2327_v15 = vmul.f32 -1.442695, %v817_v3 }
 0x237   :  { %2486 = vpow2.f32 %v2326_v10 }
 0x238   :  { %2488 = vtanh.f32 %v816_v35 }
 0x239   :  { %2490 = vpow2.f32 %v2327_v15 }
 0x242   :  { %v2485_v44 = vpop.eup %2484 }
 0x243   :  { %v821_v16 = vadd.f32 1.0, %v2485_v44 }
 0x244   :  { %v2487_v8 = vpop.eup %2486 }
 0x245   :  { %2492 = vrcp.f32 %v821_v16  ;;  %v827_v11 = vadd.f32 1.0, %v2487_v8  ;;  %v2489_v9 = vpop.eup %2488  ;;  %v4171_v16 = vld [vmem:[#allocation46_spill] sm:$0xff]  ;;  %v4172_v8 = vld [vmem:[#allocation47_spill] sm:$0xff] }
 0x246   :  { %v2491_v0 = vpop.eup %2490 }
 0x247   :  { %2494 = vrcp.f32 %v827_v11  ;;  %v834_v12 = vadd.f32 1.0, %v2491_v0 }
 0x249   :  { %2496 = vrcp.f32 %v834_v12 }
 0x252   :  { %v2493_v7 = vpop.eup %2492 }
 0x253   :  { %v838_v18 = vmul.f32 %v2493_v7, %v2489_v9  ;;  %v4173_v9 = vld [vmem:[#allocation45_spill] sm:$0xff] }
 0x254   :  { %v2495_v17 = vpop.eup %2494 }
 0x255   :  { %v837_v10 = vmul.f32 %v2495_v17, %v3326_v19 }
 0x256   :  { %v2497_v26 = vpop.eup %2496 }
 0x257   :  { %v3400_v53 = vadd.f32 %v838_v18, %v837_v10 }
 0x259   :  { %2498 = vtanh.f32 %v3400_v53 }
 0x266   :  { %v2499_v13 = vpop.eup %2498 }
 0x267   :  { %v841_v3 = vmul.f32 %v2499_v13, %v2497_v26 }
 0x269   :  { %911 = vmatmul.mubr.f32.vlgmr.msra.gmra.mxu0 %v841_v3  ;;  %982 = vmatmul.mubr.f32.vlgmr.msra.gmra.mxu1 %v841_v3 }
 0x26a   :  { %1021 = vmatpush1.msra.mxu0 %v2909_v20  ;;  %1092 = vmatpush1.msra.mxu1 %v2911_v21  ;;  %v4150_v20 = vld [vmem:[#allocation23_spill] sm:$0xff]  ;;  %v4151_v21 = vld [vmem:[#allocation24_spill] sm:$0xff] }
 0x26b   :  { %1022 = vmatprep.subr.mxu0 %v2915_v22  ;;  %1093 = vmatprep.subr.mxu1 %v2917_v23  ;;  %v4152_v22 = vld [vmem:[#allocation25_spill] sm:$0xff]  ;;  %v4153_v23 = vld [vmem:[#allocation26_spill] sm:$0xff] }
 0x26c   :  { %1023 = vmatpush1.msra.mxu0 %v2923_v24  ;;  %1094 = vmatpush1.msra.mxu1 %v2925_v25  ;;  %v4154_v24 = vld [vmem:[#allocation27_spill] sm:$0xff]  ;;  %v4155_v25 = vld [vmem:[#allocation28_spill] sm:$0xff] }
 0x26d   :  { %1024 = vmatprep.subr.mxu0 %v2934_v27  ;;  %1095 = vmatprep.subr.mxu1 %v2936_v28  ;;  %v4156_v27 = vld [vmem:[#allocation29_spill] sm:$0xff]  ;;  %v4157_v28 = vld [vmem:[#allocation30_spill] sm:$0xff] }
 0x26e   :  { %1025 = vmatpush1.msra.mxu0 %v2940_v29  ;;  %1096 = vmatpush1.msra.mxu1 %v2942_v30  ;;  %v4158_v29 = vld [vmem:[#allocation31_spill] sm:$0xff]  ;;  %v4159_v30 = vld [vmem:[#allocation32_spill] sm:$0xff] }
 0x26f   :  { %1026 = vmatprep.subr.mxu0 %v2946_v31  ;;  %1097 = vmatprep.subr.mxu1 %v2948_v32  ;;  %v4160_v31 = vld [vmem:[#allocation33_spill] sm:$0xff]  ;;  %v4161_v32 = vld [vmem:[#allocation34_spill] sm:$0xff] }
 0x270   :  { %1027 = vmatpush1.msra.mxu0 %v2954_v33  ;;  %1098 = vmatpush1.msra.mxu1 %v2956_v34  ;;  %v4162_v33 = vld [vmem:[#allocation35_spill] sm:$0xff]  ;;  %v4163_v34 = vld [vmem:[#allocation36_spill] sm:$0xff] }
 0x271   :  { %1028 = vmatprep.subr.mxu0 %v2965_v36  ;;  %1099 = vmatprep.subr.mxu1 %v2967_v37  ;;  %v4164_v36 = vld [vmem:[#allocation37_spill] sm:$0xff]  ;;  %v4165_v37 = vld [vmem:[#allocation38_spill] sm:$0xff] }
 0x272   :  { %1029 = vmatpush1.msra.mxu0 %v2971_v38  ;;  %1100 = vmatpush1.msra.mxu1 %v2973_v39  ;;  %v4166_v38 = vmov 0.0   ;;  %v4167_v39 = vld [vmem:[#allocation39_spill] sm:$0xff] }
 0x273   :  { %1030 = vmatprep.subr.mxu0 %v2977_v40  ;;  %1101 = vmatprep.subr.mxu1 %v2979_v41  ;;  %v3467_v40 = vld [vmem:[#allocation8 + $0x1e8] sm:$0xff]  ;;  %v3470_v41 = vld [vmem:[#allocation8 + $0x1f8] sm:$0xff] }
 0x274   :  { %1031 = vmatpush1.msra.mxu0 %v2985_v42  ;;  %1102 = vmatpush1.msra.mxu1 %v2987_v43  ;;  %4168 = vst [vmem:[#allocation19_spill] sm:$0xff] %v3467_v40  ;;  %4169 = vst [vmem:[#allocation20_spill] sm:$0xff] %v3470_v41  ;;  %v4170_v43 = vld [vmem:[#allocation44_spill] sm:$0xff] }
 0x275   :  { %1032 = vmatprep.subr.mxu0 %v2996_v45  ;;  %1103 = vmatprep.subr.mxu1 %v2998_v46 }
 0x276   :  { %1033 = vmatpush1.msra.mxu0 %v3002_v47  ;;  %1104 = vmatpush1.msra.mxu1 %v3004_v48 }
 0x277   :  { %1034 = vmatprep.subr.mxu0 %v3008_v49  ;;  %1105 = vmatprep.subr.mxu1 %v3010_v50 }
 0x278   :  { %1035 = vmatpush1.msra.mxu0 %v3016_v51  ;;  %1106 = vmatpush1.msra.mxu1 %v3018_v52 }
 0x279   :  { %1036 = vmatprep.subr.mxu0 %v3027_v54  ;;  %1107 = vmatprep.subr.mxu1 %v3029_v55 }
 0x27a   :  { %1037 = vmatpush1.msra.mxu0 %v3033_v56  ;;  %1108 = vmatpush1.msra.mxu1 %v3035_v57 }
 0x27b   :  { %1038 = vmatprep.subr.mxu0 %v3039_v58  ;;  %1109 = vmatprep.subr.mxu1 %v3041_v59 }
 0x27c   :  { %1039 = vmatpush1.msra.mxu0 %v3047_v60  ;;  %1110 = vmatpush1.msra.mxu1 %v3049_v61 }
 0x27d   :  { %1040 = vmatprep.subr.mxu0 %v3058_v63  ;;  %1111 = vmatprep.subr.mxu1 %v3060_v1 }
 0x27e   :  { %1041 = vmatpush1.msra.mxu0 %v3064_v2  ;;  %1112 = vmatpush1.msra.mxu1 %v4123_v62 }
 0x27f   :  { %1042 = vmatprep.subr.mxu0 %v4124_v14  ;;  %1113 = vmatprep.subr.mxu1 %v4125_v6 }
 0x280   :  { %1043 = vmatpush1.msra.mxu0 %v4126_v5  ;;  %1114 = vmatpush1.msra.mxu1 %v4150_v20 }
 0x281   :  { %1044 = vmatprep.subr.mxu0 %v4151_v21  ;;  %1115 = vmatprep.subr.mxu1 %v4152_v22 }
 0x282   :  { %1045 = vmatpush1.msra.mxu0 %v4153_v23  ;;  %1116 = vmatpush1.msra.mxu1 %v4154_v24 }
 0x283   :  { %1046 = vmatprep.subr.mxu0 %v4155_v25  ;;  %1117 = vmatprep.subr.mxu1 %v4156_v27 }
 0x284   :  { %1047 = vmatpush1.msra.mxu0 %v4157_v28  ;;  %1118 = vmatpush1.msra.mxu1 %v4158_v29 }
 0x285   :  { %1048 = vmatprep.subr.mxu0 %v4159_v30  ;;  %1119 = vmatprep.subr.mxu1 %v4160_v31 }
 0x286   :  { %1049 = vmatpush1.msra.mxu0 %v4161_v32  ;;  %1120 = vmatpush1.msra.mxu1 %v4162_v33 }
 0x287   :  { %1050 = vmatprep.subr.mxu0 %v4163_v34  ;;  %1121 = vmatprep.subr.mxu1 %v4164_v36 }
 0x288   :  { %1051 = vmatpush1.msra.mxu0 %v4165_v37  ;;  %1084 = vmatprep.mubr.f32.mxu0 %v4166_v38 }
 0x289   :  { %1122 = vmatpush1.msra.mxu1 %v4167_v39  ;;  %1155 = vmatprep.mubr.f32.mxu1 %v4166_v38 }
 0x28a   :  { %1194 = vmatprep.subr.mxu0 %v3467_v40  ;;  %1265 = vmatprep.subr.mxu1 %v3470_v41 }
 0x329   :  { %v912_v42 = vpop.f32.mrf.mxu0  ;;  %v983_v4 = vpop.f32.mrf.mxu1 }
 0x32a   :  { %v988_v45 = vadd.f32 %v912_v42, %v4170_v43  ;;  %v990_v0 = vadd.f32 %v983_v4, %v4173_v9  ;;  %v3496_v9 = vld [vmem:[#allocation8 + $0x1d0] sm:$0xff] }
 0x32b   :  { %v914_v46 = vpop.f32.mrf.mxu0  ;;  %v985_v44 = vpop.f32.mrf.mxu1 }
 0x32c   :  { %v2328_v19 = vmul.f32 -1.442695, %v988_v45  ;;  %v989_v15 = vadd.f32 %v914_v46, %v4171_v16  ;;  %v991_v11 = vadd.f32 %v985_v44, %v4172_v8  ;;  %v3484_v44 = vld [vmem:[#allocation8 + $0x1f0] sm:$0xff]  ;;  %v3487_v8 = vld [vmem:[#allocation8 + $0x1c8] sm:$0xff] }
 0x32e   :  { %2500 = vpow2.f32 %v2328_v19  ;;  %v2329_v35 = vmul.f32 -1.442695, %v989_v15  ;;  %v2330_v7 = vmul.f32 -1.442695, %v991_v11  ;;  %v3493_v11 = vld [vmem:[#allocation8 + $0x1c0] sm:$0xff] }
 0x330   :  { %2502 = vpow2.f32 %v2329_v35  ;;  %v3481_v35 = vld [vmem:[#allocation8 + $0x1e0] sm:$0xff] }
 0x331   :  { %2504 = vtanh.f32 %v990_v0  ;;  %v3499_v0 = vld [vmem:[#allocation8 + $0x1a8] sm:$0xff] }
 0x332   :  { %2506 = vpow2.f32 %v2330_v7  ;;  %v3502_v7 = vld [vmem:[#allocation8 + $0x1b8] sm:$0xff] }
 0x33b   :  { %v2501_v18 = vpop.eup %2500 }
 0x33c   :  { %v995_v17 = vadd.f32 1.0, %v2501_v18  ;;  %v3505_v18 = vld [vmem:[#allocation8 + $0x1a0] sm:$0xff] }
 0x33d   :  { %v2503_v12 = vpop.eup %2502 }
 0x33e   :  { %2508 = vrcp.f32 %v995_v17  ;;  %v1001_v10 = vadd.f32 1.0, %v2503_v12  ;;  %v2505_v26 = vpop.eup %2504  ;;  %v3508_v17 = vld [vmem:[#allocation8 + $0x1b0] sm:$0xff]  ;;  %v3511_v12 = vld [vmem:[#allocation8 + $0x188] sm:$0xff] }
 0x33f   :  { %v2507_v13 = vpop.eup %2506 }
 0x340   :  { %2510 = vrcp.f32 %v1001_v10  ;;  %v1008_v45 = vadd.f32 1.0, %v2507_v13  ;;  %v3514_v10 = vld [vmem:[#allocation8 + $0x198] sm:$0xff]  ;;  %v3520_v13 = vld [vmem:[#allocation8 + $0x190] sm:$0xff] }
 0x342   :  { %2512 = vrcp.f32 %v1008_v45  ;;  %v3532_v45 = vld [vmem:[#allocation8 + $0x170] sm:$0xff] }
 0x343   :  { %4175 = vst [vmem:[#allocation22_spill] sm:$0xff] %v3532_v45 }
 0x34b   :  { %v2509_v3 = vpop.eup %2508 }
 0x34c   :  { %v1012_v42 = vmul.f32 %v2509_v3, %v2505_v26  ;;  %v3517_v26 = vld [vmem:[#allocation8 + $0x180] sm:$0xff]  ;;  %v3523_v3 = vld [vmem:[#allocation8 + $0x168] sm:$0xff] }
 0x34d   :  { %v2511_v43 = vpop.eup %2510 }
 0x34e   :  { %v1011_v46 = vmul.f32 %v2511_v43, %v3400_v53  ;;  %v3490_v53 = vld [vmem:[#allocation8 + $0x1d8] sm:$0xff]  ;;  %v3529_v43 = vld [vmem:[#allocation8 + $0x160] sm:$0xff] }
 0x34f   :  { %v2513_v16 = vpop.eup %2512  ;;  %4174 = vst [vmem:[#allocation21_spill] sm:$0xff] %v3529_v43 }
 0x350   :  { %v3478_v19 = vadd.f32 %v1012_v42, %v1011_v46  ;;  %v3526_v42 = vld [vmem:[#allocation8 + $0x178] sm:$0xff]  ;;  %v3535_v46 = vld [vmem:[#allocation8 + $0x148] sm:$0xff] }
 0x352   :  { %2514 = vtanh.f32 %v3478_v19 }
 0x35f   :  { %v2515_v15 = vpop.eup %2514 }
 0x360   :  { %v1015_v4 = vmul.f32 %v2515_v15, %v2513_v16  ;;  %v3538_v16 = vld [vmem:[#allocation8 + $0x158] sm:$0xff]  ;;  %v3541_v15 = vld [vmem:[#allocation8 + $0x140] sm:$0xff] }
 0x362   :  { %1085 = vmatmul.mubr.f32.vlgmr.msra.gmra.mxu0 %v1015_v4  ;;  %1156 = vmatmul.mubr.f32.vlgmr.msra.gmra.mxu1 %v1015_v4  ;;  %v3544_v4 = vld [vmem:[#allocation8 + $0x150] sm:$0xff] }
 0x363   :  { %1195 = vmatpush1.msra.mxu0 %v3481_v35  ;;  %1266 = vmatpush1.msra.mxu1 %v3484_v44 }
 0x364   :  { %1196 = vmatprep.subr.mxu0 %v3487_v8  ;;  %1267 = vmatprep.subr.mxu1 %v3490_v53 }
 0x365   :  { %1197 = vmatpush1.msra.mxu0 %v3493_v11  ;;  %1268 = vmatpush1.msra.mxu1 %v3496_v9 }
 0x366   :  { %1198 = vmatprep.subr.mxu0 %v3499_v0  ;;  %1269 = vmatprep.subr.mxu1 %v3502_v7 }
 0x367   :  { %1199 = vmatpush1.msra.mxu0 %v3505_v18  ;;  %1270 = vmatpush1.msra.mxu1 %v3508_v17 }
 0x368   :  { %1200 = vmatprep.subr.mxu0 %v3511_v12  ;;  %1271 = vmatprep.subr.mxu1 %v3514_v10 }
 0x369   :  { %1201 = vmatpush1.msra.mxu0 %v3517_v26  ;;  %1272 = vmatpush1.msra.mxu1 %v3520_v13 }
 0x36a   :  { %1202 = vmatprep.subr.mxu0 %v3523_v3  ;;  %1273 = vmatprep.subr.mxu1 %v3526_v42 }
 0x36b   :  { %1203 = vmatpush1.msra.mxu0 %v3529_v43  ;;  %1274 = vmatpush1.msra.mxu1 %v3532_v45  ;;  %v3547_v43 = vld [vmem:[#allocation8 + $0x128] sm:$0xff]  ;;  %v3550_v45 = vld [vmem:[#allocation8 + $0x138] sm:$0xff] }
 0x36c   :  { %1204 = vmatprep.subr.mxu0 %v3535_v46  ;;  %1275 = vmatprep.subr.mxu1 %v3538_v16 }
 0x36d   :  { %1205 = vmatpush1.msra.mxu0 %v3541_v15  ;;  %1276 = vmatpush1.msra.mxu1 %v3544_v4 }
 0x36e   :  { %1206 = vmatprep.subr.mxu0 %v3547_v43  ;;  %1277 = vmatprep.subr.mxu1 %v3550_v45 }
 0x36f   :  { %1207 = vmatpush1.msra.mxu0 %v3002_v47  ;;  %1278 = vmatpush1.msra.mxu1 %v3004_v48  ;;  %v4176_v48 = vld [vmem:[#allocation48_spill] sm:$0xff] }
 0x370   :  { %1208 = vmatprep.subr.mxu0 %v3008_v49  ;;  %1279 = vmatprep.subr.mxu1 %v3010_v50 }
 0x371   :  { %1209 = vmatpush1.msra.mxu0 %v3016_v51  ;;  %1280 = vmatpush1.msra.mxu1 %v3018_v52  ;;  %v4177_v52 = vld [vmem:[#allocation50_spill] sm:$0xff] }
 0x372   :  { %1210 = vmatprep.subr.mxu0 %v3027_v54  ;;  %1281 = vmatprep.subr.mxu1 %v3029_v55 }
 0x373   :  { %1211 = vmatpush1.msra.mxu0 %v3033_v56  ;;  %1282 = vmatpush1.msra.mxu1 %v3035_v57 }
 0x374   :  { %1212 = vmatprep.subr.mxu0 %v3039_v58  ;;  %1283 = vmatprep.subr.mxu1 %v3041_v59  ;;  %v4178_v58 = vld [vmem:[#allocation51_spill] sm:$0xff] }
 0x375   :  { %1213 = vmatpush1.msra.mxu0 %v3047_v60  ;;  %1284 = vmatpush1.msra.mxu1 %v3049_v61  ;;  %v4179_v60 = vld [vmem:[#allocation49_spill] sm:$0xff] }
 0x376   :  { %1214 = vmatprep.subr.mxu0 %v3058_v63  ;;  %1285 = vmatprep.subr.mxu1 %v3060_v1 }
 0x377   :  { %1215 = vmatpush1.msra.mxu0 %v3064_v2  ;;  %1286 = vmatpush1.msra.mxu1 %v4123_v62 }
 0x378   :  { %1216 = vmatprep.subr.mxu0 %v4124_v14  ;;  %1287 = vmatprep.subr.mxu1 %v4125_v6 }
 0x379   :  { %1217 = vmatpush1.msra.mxu0 %v4126_v5  ;;  %1288 = vmatpush1.msra.mxu1 %v4150_v20 }
 0x37a   :  { %1218 = vmatprep.subr.mxu0 %v4151_v21  ;;  %1289 = vmatprep.subr.mxu1 %v4152_v22 }
 0x37b   :  { %1219 = vmatpush1.msra.mxu0 %v4153_v23  ;;  %1290 = vmatpush1.msra.mxu1 %v4154_v24 }
 0x37c   :  { %1220 = vmatprep.subr.mxu0 %v4155_v25  ;;  %1291 = vmatprep.subr.mxu1 %v4156_v27 }
 0x37d   :  { %1221 = vmatpush1.msra.mxu0 %v4157_v28  ;;  %1292 = vmatpush1.msra.mxu1 %v4158_v29 }
 0x37e   :  { %1222 = vmatprep.subr.mxu0 %v4159_v30  ;;  %1293 = vmatprep.subr.mxu1 %v4160_v31  ;;  %v4180_v30 = vld [vmem:[#allocation21_spill] sm:$0xff]  ;;  %v4181_v31 = vld [vmem:[#allocation22_spill] sm:$0xff] }
 0x37f   :  { %1223 = vmatpush1.msra.mxu0 %v4161_v32  ;;  %1294 = vmatpush1.msra.mxu1 %v4162_v33  ;;  %v3627_v32 = vld [vmem:[#allocation8 + $0x120] sm:$0xff]  ;;  %v3630_v33 = vld [vmem:[#allocation8 + $0x130] sm:$0xff] }
 0x380   :  { %1224 = vmatprep.subr.mxu0 %v4163_v34  ;;  %1295 = vmatprep.subr.mxu1 %v4164_v36  ;;  %v3633_v34 = vld [vmem:[#allocation8 + $0x108] sm:$0xff]  ;;  %v3636_v36 = vld [vmem:[#allocation8 + $0x118] sm:$0xff] }
 0x381   :  { %1225 = vmatpush1.msra.mxu0 %v4165_v37  ;;  %1258 = vmatprep.mubr.f32.mxu0 %v4166_v38  ;;  %v3639_v37 = vld [vmem:[#allocation8 + $0x100] sm:$0xff] }
 0x382   :  { %1296 = vmatpush1.msra.mxu1 %v4167_v39  ;;  %1329 = vmatprep.mubr.f32.mxu1 %v4166_v38  ;;  %v3642_v39 = vld [vmem:[#allocation8 + $0x110] sm:$0xff] }
 0x383   :  { %1368 = vmatprep.subr.mxu0 %v3467_v40  ;;  %1439 = vmatprep.subr.mxu1 %v3470_v41 }
 0x422   :  { %v1086_v47 = vpop.f32.mrf.mxu0  ;;  %v1157_v55 = vpop.f32.mrf.mxu1 }
 0x423   :  { %v1162_v49 = vadd.f32 %v1086_v47, %v4176_v48  ;;  %v1164_v61 = vadd.f32 %v1157_v55, %v4179_v60  ;;  %v3648_v47 = vld [vmem:[#allocation8 + $0xf8] sm:$0xff]  ;;  %v3651_v48 = vld [vmem:[#allocation8 + $0xe0] sm:$0xff]  ;;  %v3669_v55 = vld [vmem:[#allocation8 + $0xa8] sm:$0xff] }
 0x424   :  { %v1088_v50 = vpop.f32.mrf.mxu0  ;;  %v1159_v57 = vpop.f32.mrf.mxu1  ;;  %v3684_v60 = vld [vmem:[#allocation8 + $0x98] sm:$0xff] }
 0x425   :  { %v2331_v51 = vmul.f32 -1.442695, %v1162_v49  ;;  %v1163_v54 = vadd.f32 %v1088_v50, %v4177_v52  ;;  %v1165_v59 = vadd.f32 %v1159_v57, %v4178_v58  ;;  %v3654_v49 = vld [vmem:[#allocation8 + $0xf0] sm:$0xff]  ;;  %v3657_v50 = vld [vmem:[#allocation8 + $0xc8] sm:$0xff]  ;;  %v3663_v52 = vld [vmem:[#allocation8 + $0xc0] sm:$0xff] }
 0x426   :  { %v3675_v57 = vld [vmem:[#allocation8 + $0xa0] sm:$0xff]  ;;  %v3678_v58 = vld [vmem:[#allocation8 + $0xb0] sm:$0xff] }
 0x427   :  { %2516 = vpow2.f32 %v2331_v51  ;;  %v2332_v56 = vmul.f32 -1.442695, %v1163_v54  ;;  %v2333_v63 = vmul.f32 -1.442695, %v1165_v59  ;;  %v3660_v51 = vld [vmem:[#allocation8 + $0xd8] sm:$0xff]  ;;  %v3666_v54 = vld [vmem:[#allocation8 + $0xd0] sm:$0xff] }
 0x428   :  { %v3681_v59 = vld [vmem:[#allocation8 + $0x88] sm:$0xff] }
 0x429   :  { %2518 = vpow2.f32 %v2332_v56  ;;  %v3672_v56 = vld [vmem:[#allocation8 + $0xb8] sm:$0xff] }
 0x42a   :  { %2520 = vtanh.f32 %v1164_v61  ;;  %v3687_v61 = vld [vmem:[#allocation8 + $0x80] sm:$0xff] }
 0x42b   :  { %2522 = vpow2.f32 %v2333_v63  ;;  %v3690_v63 = vld [vmem:[#allocation8 + $0x90] sm:$0xff] }
 0x42c   :  { %4182 = vst [vmem:[#allocation17_spill] sm:$0xff] %v3690_v63 }
 0x434   :  { %v2517_v1 = vpop.eup %2516 }
 0x435   :  { %v1169_v2 = vadd.f32 1.0, %v2517_v1  ;;  %v3693_v1 = vld [vmem:[#allocation8 + $0x68] sm:$0xff] }
 0x436   :  { %v2519_v62 = vpop.eup %2518  ;;  %4183 = vst [vmem:[#allocation18_spill] sm:$0xff] %v3693_v1 }
 0x437   :  { %2524 = vrcp.f32 %v1169_v2  ;;  %v1175_v14 = vadd.f32 1.0, %v2519_v62  ;;  %v2521_v6 = vpop.eup %2520  ;;  %v3696_v2 = vld [vmem:[#allocation8 + $0x78] sm:$0xff]  ;;  %v3699_v62 = vld [vmem:[#allocation8 + $0x60] sm:$0xff] }
 0x438   :  { %v2523_v5 = vpop.eup %2522  ;;  %4184 = vst [vmem:[#allocation42_spill] sm:$0xff] %v3696_v2  ;;  %4185 = vst [vmem:[#allocation43_spill] sm:$0xff] %v3699_v62 }
 0x439   :  { %2526 = vrcp.f32 %v1175_v14  ;;  %v1182_v23 = vadd.f32 1.0, %v2523_v5  ;;  %v3702_v14 = vld [vmem:[#allocation8 + $0x70] sm:$0xff]  ;;  %v3708_v5 = vld [vmem:[#allocation8 + $0x58] sm:$0xff] }
 0x43a   :  { %4186 = vst [vmem:[#allocation41_spill] sm:$0xff] %v3702_v14  ;;  %4188 = vst [vmem:[#allocation24_spill] sm:$0xff] %v3708_v5 }
 0x43b   :  { %2528 = vrcp.f32 %v1182_v23  ;;  %v3720_v23 = vld [vmem:[#allocation8 + $0x38] sm:$0xff] }
 0x43c   :  { %4192 = vst [vmem:[#allocation28_spill] sm:$0xff] %v3720_v23 }
 0x444   :  { %v2525_v20 = vpop.eup %2524 }
 0x445   :  { %v1186_v21 = vmul.f32 %v2525_v20, %v2521_v6  ;;  %v3705_v6 = vld [vmem:[#allocation8 + $0x48] sm:$0xff]  ;;  %v3711_v20 = vld [vmem:[#allocation8 + $0x40] sm:$0xff] }
 0x446   :  { %v2527_v22 = vpop.eup %2526  ;;  %4187 = vst [vmem:[#allocation23_spill] sm:$0xff] %v3705_v6  ;;  %4189 = vst [vmem:[#allocation25_spill] sm:$0xff] %v3711_v20 }
 0x447   :  { %v1185_v24 = vmul.f32 %v2527_v22, %v3478_v19  ;;  %v3645_v19 = vld [vmem:[#allocation8 + $0xe8] sm:$0xff] }
 0x448   :  { %v2529_v27 = vpop.eup %2528  ;;  %v3717_v22 = vld [vmem:[#allocation8 + $0x28] sm:$0xff] }
 0x449   :  { %v3600_v25 = vadd.f32 %v1186_v21, %v1185_v24  ;;  %v3714_v21 = vld [vmem:[#allocation8 + $0x50] sm:$0xff]  ;;  %4191 = vst [vmem:[#allocation27_spill] sm:$0xff] %v3717_v22  ;;  %v3723_v24 = vld [vmem:[#allocation8 + $0x20] sm:$0xff] }
 0x44a   :  { %4190 = vst [vmem:[#allocation26_spill] sm:$0xff] %v3714_v21  ;;  %4193 = vst [vmem:[#allocation29_spill] sm:$0xff] %v3723_v24 }
 0x44b   :  { %2530 = vtanh.f32 %v3600_v25 }
 0x458   :  { %v2531_v28 = vpop.eup %2530 }
 0x459   :  { %v1189_v29 = vmul.f32 %v2531_v28, %v2529_v27  ;;  %v3726_v27 = vld [vmem:[#allocation8 + $0x30] sm:$0xff]  ;;  %v3729_v28 = vld [vmem:[#allocation8 + $0x8] sm:$0xff] }
 0x45a   :  { %4194 = vst [vmem:[#allocation30_spill] sm:$0xff] %v3726_v27  ;;  %4195 = vst [vmem:[#allocation31_spill] sm:$0xff] %v3729_v28 }
 0x45b   :  { %1259 = vmatmul.mubr.f32.vlgmr.msra.gmra.mxu0 %v1189_v29  ;;  %1330 = vmatmul.mubr.f32.vlgmr.msra.gmra.mxu1 %v1189_v29  ;;  %v3732_v29 = vld [vmem:[#allocation8 + $0x18] sm:$0xff] }
 0x45c   :  { %1369 = vmatpush1.msra.mxu0 %v3481_v35  ;;  %1440 = vmatpush1.msra.mxu1 %v3484_v44  ;;  %4196 = vst [vmem:[#allocation32_spill] sm:$0xff] %v3732_v29 }
 0x45d   :  { %1370 = vmatprep.subr.mxu0 %v3487_v8  ;;  %1441 = vmatprep.subr.mxu1 %v3490_v53 }
 0x45e   :  { %1371 = vmatpush1.msra.mxu0 %v3493_v11  ;;  %1442 = vmatpush1.msra.mxu1 %v3496_v9 }
 0x45f   :  { %1372 = vmatprep.subr.mxu0 %v3499_v0  ;;  %1443 = vmatprep.subr.mxu1 %v3502_v7 }
 0x460   :  { %1373 = vmatpush1.msra.mxu0 %v3505_v18  ;;  %1444 = vmatpush1.msra.mxu1 %v3508_v17 }
 0x461   :  { %1374 = vmatprep.subr.mxu0 %v3511_v12  ;;  %1445 = vmatprep.subr.mxu1 %v3514_v10 }
 0x462   :  { %1375 = vmatpush1.msra.mxu0 %v3517_v26  ;;  %1446 = vmatpush1.msra.mxu1 %v3520_v13 }
 0x463   :  { %1376 = vmatprep.subr.mxu0 %v3523_v3  ;;  %1447 = vmatprep.subr.mxu1 %v3526_v42 }
 0x464   :  { %1377 = vmatpush1.msra.mxu0 %v4180_v30  ;;  %1448 = vmatpush1.msra.mxu1 %v4181_v31 }
 0x465   :  { %1378 = vmatprep.subr.mxu0 %v3535_v46  ;;  %1449 = vmatprep.subr.mxu1 %v3538_v16 }
 0x466   :  { %1379 = vmatpush1.msra.mxu0 %v3541_v15  ;;  %1450 = vmatpush1.msra.mxu1 %v3544_v4 }
 0x467   :  { %1380 = vmatprep.subr.mxu0 %v3547_v43  ;;  %1451 = vmatprep.subr.mxu1 %v3550_v45 }
 0x468   :  { %1381 = vmatpush1.msra.mxu0 %v3627_v32  ;;  %1452 = vmatpush1.msra.mxu1 %v3630_v33 }
 0x469   :  { %1382 = vmatprep.subr.mxu0 %v3633_v34  ;;  %1453 = vmatprep.subr.mxu1 %v3636_v36 }
 0x46a   :  { %1383 = vmatpush1.msra.mxu0 %v3639_v37  ;;  %1454 = vmatpush1.msra.mxu1 %v3642_v39 }
 0x46b   :  { %1384 = vmatprep.subr.mxu0 %v3645_v19  ;;  %1455 = vmatprep.subr.mxu1 %v3648_v47 }
 0x46c   :  { %1385 = vmatpush1.msra.mxu0 %v3651_v48  ;;  %1456 = vmatpush1.msra.mxu1 %v3654_v49 }
 0x46d   :  { %1386 = vmatprep.subr.mxu0 %v3657_v50  ;;  %1457 = vmatprep.subr.mxu1 %v3660_v51 }
 0x46e   :  { %1387 = vmatpush1.msra.mxu0 %v3663_v52  ;;  %1458 = vmatpush1.msra.mxu1 %v3666_v54 }
 0x46f   :  { %1388 = vmatprep.subr.mxu0 %v3669_v55  ;;  %1459 = vmatprep.subr.mxu1 %v3672_v56 }
 0x470   :  { %1389 = vmatpush1.msra.mxu0 %v3675_v57  ;;  %1460 = vmatpush1.msra.mxu1 %v3678_v58 }
 0x471   :  { %1390 = vmatprep.subr.mxu0 %v3681_v59  ;;  %1461 = vmatprep.subr.mxu1 %v3684_v60 }
 0x472   :  { %1391 = vmatpush1.msra.mxu0 %v3687_v61  ;;  %1462 = vmatpush1.msra.mxu1 %v3690_v63 }
 0x473   :  { %1392 = vmatprep.subr.mxu0 %v3693_v1  ;;  %1463 = vmatprep.subr.mxu1 %v3696_v2  ;;  %v4202_v2 = vld [vmem:[#allocation53_spill] sm:$0xff] }
 0x474   :  { %1393 = vmatpush1.msra.mxu0 %v3699_v62  ;;  %1464 = vmatpush1.msra.mxu1 %v3702_v14  ;;  %v4201_v62 = vld [vmem:[#allocation55_spill] sm:$0xff] }
 0x475   :  { %1394 = vmatprep.subr.mxu0 %v3705_v6  ;;  %1465 = vmatprep.subr.mxu1 %v3708_v5 }
 0x476   :  { %1395 = vmatpush1.msra.mxu0 %v3711_v20  ;;  %1466 = vmatpush1.msra.mxu1 %v3714_v21  ;;  %v4200_v20 = vld [vmem:[#allocation54_spill] sm:$0xff] }
 0x477   :  { %1396 = vmatprep.subr.mxu0 %v3717_v22  ;;  %1467 = vmatprep.subr.mxu1 %v3720_v23  ;;  %v3735_v22 = vld [vmem:[#allocation8] sm:$0xff]  ;;  %v3739_v23 = vld [vmem:[#allocation8 + $0x10] sm:$0xff] }
 0x478   :  { %1397 = vmatpush1.msra.mxu0 %v3723_v24  ;;  %1468 = vmatpush1.msra.mxu1 %v3726_v27  ;;  %4197 = vst [vmem:[#allocation33_spill] sm:$0xff] %v3735_v22  ;;  %4198 = vst [vmem:[#allocation34_spill] sm:$0xff] %v3739_v23  ;;  %v4199_v27 = vld [vmem:[#allocation52_spill] sm:$0xff] }
 0x479   :  { %1398 = vmatprep.subr.mxu0 %v3729_v28  ;;  %1469 = vmatprep.subr.mxu1 %v3732_v29 }
 0x47a   :  { %1399 = vmatpush1.msra.mxu0 %v3735_v22  ;;  %1432 = vmatprep.mubr.f32.mxu0 %v4166_v38 }
 0x47b   :  { %1470 = vmatpush1.msra.mxu1 %v3739_v23  ;;  %1503 = vmatprep.mubr.f32.mxu1 %v4166_v38 }
 0x47c   :  { %1542 = vmatprep.subr.mxu0 %v3467_v40  ;;  %1613 = vmatprep.subr.mxu1 %v3470_v41 }
 0x51b   :  { %v1260_v28 = vpop.f32.mrf.mxu0  ;;  %v1331_v22 = vpop.f32.mrf.mxu1 }
 0x51c   :  { %v1336_v24 = vadd.f32 %v1260_v28, %v4199_v27  ;;  %v1338_v38 = vadd.f32 %v1331_v22, %v4202_v2  ;;  %v4208_v22 = vld [vmem:[#allocation23_spill] sm:$0xff] }
 0x51d   :  { %v1262_v29 = vpop.f32.mrf.mxu0  ;;  %v1333_v14 = vpop.f32.mrf.mxu1 }
 0x51e   :  { %v2334_v21 = vmul.f32 -1.442695, %v1336_v24  ;;  %v1337_v5 = vadd.f32 %v1262_v29, %v4200_v20  ;;  %v1339_v23 = vadd.f32 %v1333_v14, %v4201_v62  ;;  %v4207_v14 = vld [vmem:[#allocation41_spill] sm:$0xff] }
 0x520   :  { %2532 = vpow2.f32 %v2334_v21  ;;  %v2335_v6 = vmul.f32 -1.442695, %v1337_v5  ;;  %v2336_v1 = vmul.f32 -1.442695, %v1339_v23  ;;  %v4209_v23 = vld [vmem:[#allocation24_spill] sm:$0xff] }
 0x522   :  { %2534 = vpow2.f32 %v2335_v6 }
 0x523   :  { %2536 = vtanh.f32 %v1338_v38 }
 0x524   :  { %2538 = vpow2.f32 %v2336_v1  ;;  %v4206_v1 = vld [vmem:[#allocation43_spill] sm:$0xff] }
 0x52d   :  { %v2533_v40 = vpop.eup %2532 }
 0x52e   :  { %v1343_v63 = vadd.f32 1.0, %v2533_v40 }
 0x52f   :  { %v2535_v41 = vpop.eup %2534 }
 0x530   :  { %2540 = vrcp.f32 %v1343_v63  ;;  %v1349_v27 = vadd.f32 1.0, %v2535_v41  ;;  %v2537_v24 = vpop.eup %2536  ;;  %v4203_v41 = vld [vmem:[#allocation17_spill] sm:$0xff]  ;;  %v4205_v63 = vld [vmem:[#allocation42_spill] sm:$0xff] }
 0x531   :  { %v2539_v20 = vpop.eup %2538 }
 0x532   :  { %2542 = vrcp.f32 %v1349_v27  ;;  %v1356_v6 = vadd.f32 1.0, %v2539_v20  ;;  %v4210_v27 = vld [vmem:[#allocation25_spill] sm:$0xff]  ;;  %v4212_v20 = vld [vmem:[#allocation27_spill] sm:$0xff] }
 0x534   :  { %2544 = vrcp.f32 %v1356_v6  ;;  %v4216_v6 = vld [vmem:[#allocation31_spill] sm:$0xff] }
 0x53d   :  { %v2541_v21 = vpop.eup %2540 }
 0x53e   :  { %v1360_v28 = vmul.f32 %v2541_v21, %v2537_v24  ;;  %v4211_v24 = vld [vmem:[#allocation26_spill] sm:$0xff]  ;;  %v4213_v21 = vld [vmem:[#allocation28_spill] sm:$0xff] }
 0x53f   :  { %v2543_v5 = vpop.eup %2542 }
 0x540   :  { %v1359_v29 = vmul.f32 %v2543_v5, %v3600_v25  ;;  %v4204_v25 = vld [vmem:[#allocation18_spill] sm:$0xff] }
 0x541   :  { %v2545_v40 = vpop.eup %2544  ;;  %v4215_v5 = vld [vmem:[#allocation30_spill] sm:$0xff] }
 0x542   :  { %v3750_v62 = vadd.f32 %v1360_v28, %v1359_v29  ;;  %v4214_v28 = vld [vmem:[#allocation29_spill] sm:$0xff]  ;;  %v4217_v29 = vld [vmem:[#allocation32_spill] sm:$0xff] }
 0x544   :  { %2546 = vtanh.f32 %v3750_v62 }
 0x551   :  { %v2547_v38 = vpop.eup %2546 }
 0x552   :  { %v1363_v2 = vmul.f32 %v2547_v38, %v2545_v40  ;;  %v4218_v40 = vld [vmem:[#allocation33_spill] sm:$0xff]  ;;  %v4219_v38 = vmov 0.0  }
 0x554   :  { %1433 = vmatmul.mubr.f32.vlgmr.msra.gmra.mxu0 %v1363_v2  ;;  %1504 = vmatmul.mubr.f32.vlgmr.msra.gmra.mxu1 %v1363_v2  ;;  %v4220_v2 = vld [vmem:[#allocation34_spill] sm:$0xff] }
 0x555   :  { %1543 = vmatpush1.msra.mxu0 %v3481_v35  ;;  %1614 = vmatpush1.msra.mxu1 %v3484_v44 }
 0x556   :  { %1544 = vmatprep.subr.mxu0 %v3487_v8  ;;  %1615 = vmatprep.subr.mxu1 %v3490_v53 }
 0x557   :  { %1545 = vmatpush1.msra.mxu0 %v3493_v11  ;;  %1616 = vmatpush1.msra.mxu1 %v3496_v9 }
 0x558   :  { %1546 = vmatprep.subr.mxu0 %v3499_v0  ;;  %1617 = vmatprep.subr.mxu1 %v3502_v7 }
 0x559   :  { %1547 = vmatpush1.msra.mxu0 %v3505_v18  ;;  %1618 = vmatpush1.msra.mxu1 %v3508_v17 }
 0x55a   :  { %1548 = vmatprep.subr.mxu0 %v3511_v12  ;;  %1619 = vmatprep.subr.mxu1 %v3514_v10 }
 0x55b   :  { %1549 = vmatpush1.msra.mxu0 %v3517_v26  ;;  %1620 = vmatpush1.msra.mxu1 %v3520_v13 }
 0x55c   :  { %1550 = vmatprep.subr.mxu0 %v3523_v3  ;;  %1621 = vmatprep.subr.mxu1 %v3526_v42 }
 0x55d   :  { %1551 = vmatpush1.msra.mxu0 %v4180_v30  ;;  %1622 = vmatpush1.msra.mxu1 %v4181_v31 }
 0x55e   :  { %1552 = vmatprep.subr.mxu0 %v3535_v46  ;;  %1623 = vmatprep.subr.mxu1 %v3538_v16 }
 0x55f   :  { %1553 = vmatpush1.msra.mxu0 %v3541_v15  ;;  %1624 = vmatpush1.msra.mxu1 %v3544_v4 }
 0x560   :  { %1554 = vmatprep.subr.mxu0 %v3547_v43  ;;  %1625 = vmatprep.subr.mxu1 %v3550_v45 }
 0x561   :  { %1555 = vmatpush1.msra.mxu0 %v3627_v32  ;;  %1626 = vmatpush1.msra.mxu1 %v3630_v33 }
 0x562   :  { %1556 = vmatprep.subr.mxu0 %v3633_v34  ;;  %1627 = vmatprep.subr.mxu1 %v3636_v36 }
 0x563   :  { %1557 = vmatpush1.msra.mxu0 %v3639_v37  ;;  %1628 = vmatpush1.msra.mxu1 %v3642_v39 }
 0x564   :  { %1558 = vmatprep.subr.mxu0 %v3645_v19  ;;  %1629 = vmatprep.subr.mxu1 %v3648_v47 }
 0x565   :  { %1559 = vmatpush1.msra.mxu0 %v3651_v48  ;;  %1630 = vmatpush1.msra.mxu1 %v3654_v49 }
 0x566   :  { %1560 = vmatprep.subr.mxu0 %v3657_v50  ;;  %1631 = vmatprep.subr.mxu1 %v3660_v51 }
 0x567   :  { %1561 = vmatpush1.msra.mxu0 %v3663_v52  ;;  %1632 = vmatpush1.msra.mxu1 %v3666_v54 }
 0x568   :  { %1562 = vmatprep.subr.mxu0 %v3669_v55  ;;  %1633 = vmatprep.subr.mxu1 %v3672_v56 }
 0x569   :  { %1563 = vmatpush1.msra.mxu0 %v3675_v57  ;;  %1634 = vmatpush1.msra.mxu1 %v3678_v58 }
 0x56a   :  { %1564 = vmatprep.subr.mxu0 %v3681_v59  ;;  %1635 = vmatprep.subr.mxu1 %v3684_v60 }
 0x56b   :  { %1565 = vmatpush1.msra.mxu0 %v3687_v61  ;;  %1636 = vmatpush1.msra.mxu1 %v4203_v41 }
 0x56c   :  { %1566 = vmatprep.subr.mxu0 %v4204_v25  ;;  %1637 = vmatprep.subr.mxu1 %v4205_v63  ;;  %v4226_v63 = vld [vmem:[#allocation57_spill] sm:$0xff] }
 0x56d   :  { %1567 = vmatpush1.msra.mxu0 %v4206_v1  ;;  %1638 = vmatpush1.msra.mxu1 %v4207_v14  ;;  %v4225_v1 = vld [vmem:[#allocation59_spill] sm:$0xff] }
 0x56e   :  { %1568 = vmatprep.subr.mxu0 %v4208_v22  ;;  %1639 = vmatprep.subr.mxu1 %v4209_v23 }
 0x56f   :  { %1569 = vmatpush1.msra.mxu0 %v4210_v27  ;;  %1640 = vmatpush1.msra.mxu1 %v4211_v24  ;;  %v4221_v24 = vld [vmem:[#allocation19_spill] sm:$0xff] }
 0x570   :  { %1570 = vmatprep.subr.mxu0 %v4212_v20  ;;  %1641 = vmatprep.subr.mxu1 %v4213_v21  ;;  %v4222_v20 = vld [vmem:[#allocation20_spill] sm:$0xff] }
 0x571   :  { %1571 = vmatpush1.msra.mxu0 %v4214_v28  ;;  %1642 = vmatpush1.msra.mxu1 %v4215_v5  ;;  %v4223_v28 = vld [vmem:[#allocation56_spill] sm:$0xff] }
 0x572   :  { %1572 = vmatprep.subr.mxu0 %v4216_v6  ;;  %1643 = vmatprep.subr.mxu1 %v4217_v29  ;;  %v4224_v6 = vld [vmem:[#allocation58_spill] sm:$0xff] }
 0x573   :  { %1573 = vmatpush1.msra.mxu0 %v4218_v40  ;;  %1606 = vmatprep.mubr.f32.mxu0 %v4219_v38 }
 0x574   :  { %1644 = vmatpush1.msra.mxu1 %v4220_v2  ;;  %1677 = vmatprep.mubr.f32.mxu1 %v4219_v38 }
 0x575   :  { %1716 = vmatprep.subr.mxu0 %v4221_v24  ;;  %1787 = vmatprep.subr.mxu1 %v4222_v20 }
 0x614   :  { %v1434_v21 = vpop.f32.mrf.mxu0  ;;  %v1505_v29 = vpop.f32.mrf.mxu1 }
 0x615   :  { %v1510_v27 = vadd.f32 %v1434_v21, %v4223_v28  ;;  %v1512_v38 = vadd.f32 %v1505_v29, %v4226_v63 }
 0x616   :  { %v1436_v5 = vpop.f32.mrf.mxu0  ;;  %v1507_v14 = vpop.f32.mrf.mxu1 }
 0x617   :  { %v2337_v23 = vmul.f32 -1.442695, %v1510_v27  ;;  %v1511_v22 = vadd.f32 %v1436_v5, %v4224_v6  ;;  %v1513_v2 = vadd.f32 %v1507_v14, %v4225_v1 }
 0x619   :  { %2548 = vpow2.f32 %v2337_v23  ;;  %v2338_v40 = vmul.f32 -1.442695, %v1511_v22  ;;  %v2339_v25 = vmul.f32 -1.442695, %v1513_v2 }
 0x61b   :  { %2550 = vpow2.f32 %v2338_v40 }
 0x61c   :  { %2552 = vtanh.f32 %v1512_v38 }
 0x61d   :  { %2554 = vpow2.f32 %v2339_v25 }
 0x626   :  { %v2549_v24 = vpop.eup %2548 }
 0x627   :  { %v1517_v41 = vadd.f32 1.0, %v2549_v24  ;;  %v1899_v24 = vld [vmem:[#allocation6 + $0x60] sm:$0xff] }
 0x628   :  { %v2551_v20 = vpop.eup %2550 }
 0x629   :  { %2556 = vrcp.f32 %v1517_v41  ;;  %v1523_v21 = vadd.f32 1.0, %v2551_v20  ;;  %v2553_v27 = vpop.eup %2552  ;;  %v1896_v20 = vld [vmem:[#allocation6 + $0x48] sm:$0xff] }
 0x62a   :  { %v2555_v28 = vpop.eup %2554 }
 0x62b   :  { %2558 = vrcp.f32 %v1523_v21  ;;  %v1530_v6 = vadd.f32 1.0, %v2555_v28  ;;  %v1901_v21 = vld [vmem:[#allocation6 + $0x70] sm:$0xff]  ;;  %v1898_v28 = vld [vmem:[#allocation6 + $0x58] sm:$0xff] }
 0x62d   :  { %2560 = vrcp.f32 %v1530_v6  ;;  %v1894_v6 = vld [vmem:[#allocation6 + $0x38] sm:$0xff] }
 0x636   :  { %v2557_v23 = vpop.eup %2556 }
 0x637   :  { %v1534_v5 = vmul.f32 %v2557_v23, %v2553_v27  ;;  %v1895_v27 = vld [vmem:[#allocation6 + $0x40] sm:$0xff]  ;;  %v1892_v23 = vld [vmem:[#allocation6 + $0x28] sm:$0xff] }
 0x638   :  { %v2559_v22 = vpop.eup %2558 }
 0x639   :  { %v1533_v40 = vmul.f32 %v2559_v22, %v3750_v62  ;;  %v1891_v22 = vld [vmem:[#allocation6 + $0x20] sm:$0xff] }
 0x63a   :  { %v2561_v63 = vpop.eup %2560 }
 0x63b   :  { %v3824_v1 = vadd.f32 %v1534_v5, %v1533_v40  ;;  %v1897_v5 = vld [vmem:[#allocation6 + $0x50] sm:$0xff]  ;;  %v1888_v40 = vld [vmem:[#allocation6 + $0x8] sm:$0xff] }
 0x63d   :  { %2562 = vtanh.f32 %v3824_v1 }
 0x64a   :  { %v2563_v14 = vpop.eup %2562 }
 0x64b   :  { %v1537_v29 = vmul.f32 %v2563_v14, %v2561_v63  ;;  %v1887_v63 = vld [vmem:[#allocation6] sm:$0xff]  ;;  %v1890_v14 = vld [vmem:[#allocation6 + $0x18] sm:$0xff] }
 0x64d   :  { %1607 = vmatmul.mubr.f32.vlgmr.msra.gmra.mxu0 %v1537_v29  ;;  %1678 = vmatmul.mubr.f32.vlgmr.msra.gmra.mxu1 %v1537_v29  ;;  %v1886_v29 = vld [vmem:[%s3963_s0 + $0x38] sm:$0xff] }
 0x64e   :  { %1717 = vmatpush1.msra.mxu0 %v3481_v35  ;;  %1788 = vmatpush1.msra.mxu1 %v3484_v44  ;;  %v4227_v35 = vld [vmem:[#allocation17_spill] sm:$0xff]  ;;  %v4228_v44 = vld [vmem:[#allocation18_spill] sm:$0xff] }
 0x64f   :  { %1718 = vmatprep.subr.mxu0 %v3487_v8  ;;  %1789 = vmatprep.subr.mxu1 %v3490_v53  ;;  %v4229_v8 = vld [vmem:[#allocation42_spill] sm:$0xff]  ;;  %v4230_v53 = vld [vmem:[#allocation43_spill] sm:$0xff] }
 0x650   :  { %1719 = vmatpush1.msra.mxu0 %v3493_v11  ;;  %1790 = vmatpush1.msra.mxu1 %v3496_v9  ;;  %v4231_v11 = vld [vmem:[#allocation41_spill] sm:$0xff]  ;;  %v4232_v9 = vld [vmem:[#allocation23_spill] sm:$0xff] }
 0x651   :  { %1720 = vmatprep.subr.mxu0 %v3499_v0  ;;  %1791 = vmatprep.subr.mxu1 %v3502_v7  ;;  %v4233_v0 = vld [vmem:[#allocation24_spill] sm:$0xff]  ;;  %v4234_v7 = vld [vmem:[#allocation25_spill] sm:$0xff] }
 0x652   :  { %1721 = vmatpush1.msra.mxu0 %v3505_v18  ;;  %1792 = vmatpush1.msra.mxu1 %v3508_v17  ;;  %v4235_v18 = vld [vmem:[#allocation26_spill] sm:$0xff]  ;;  %v4236_v17 = vld [vmem:[#allocation27_spill] sm:$0xff] }
 0x653   :  { %1722 = vmatprep.subr.mxu0 %v3511_v12  ;;  %1793 = vmatprep.subr.mxu1 %v3514_v10  ;;  %v4237_v12 = vld [vmem:[#allocation28_spill] sm:$0xff]  ;;  %v4238_v10 = vld [vmem:[#allocation29_spill] sm:$0xff] }
 0x654   :  { %1723 = vmatpush1.msra.mxu0 %v3517_v26  ;;  %1794 = vmatpush1.msra.mxu1 %v3520_v13  ;;  %v4239_v26 = vld [vmem:[#allocation30_spill] sm:$0xff]  ;;  %v4240_v13 = vld [vmem:[#allocation31_spill] sm:$0xff] }
 0x655   :  { %1724 = vmatprep.subr.mxu0 %v3523_v3  ;;  %1795 = vmatprep.subr.mxu1 %v3526_v42  ;;  %v4241_v3 = vld [vmem:[#allocation32_spill] sm:$0xff]  ;;  %v4242_v42 = vld [vmem:[#allocation33_spill] sm:$0xff] }
 0x656   :  { %1725 = vmatpush1.msra.mxu0 %v4180_v30  ;;  %1796 = vmatpush1.msra.mxu1 %v4181_v31 }
 0x657   :  { %1726 = vmatprep.subr.mxu0 %v3535_v46  ;;  %1797 = vmatprep.subr.mxu1 %v3538_v16  ;;  %v1900_v46 = vld [vmem:[#allocation6 + $0x68] sm:$0xff]  ;;  %v1902_v16 = vld [vmem:[#allocation6 + $0x78] sm:$0xff] }
 0x658   :  { %1727 = vmatpush1.msra.mxu0 %v3541_v15  ;;  %1798 = vmatpush1.msra.mxu1 %v3544_v4  ;;  %v4245_v4 = vld [vmem:[#allocation60_spill] sm:$0xff] }
 0x659   :  { %1728 = vmatprep.subr.mxu0 %v3547_v43  ;;  %1799 = vmatprep.subr.mxu1 %v3550_v45  ;;  %v4243_v43 = vmov 0.0   ;;  %v4244_v45 = vld [vmem:[#allocation34_spill] sm:$0xff] }
 0x65a   :  { %1729 = vmatpush1.msra.mxu0 %v3627_v32  ;;  %1800 = vmatpush1.msra.mxu1 %v3630_v33  ;;  %v4246_v33 = vld [vmem:[#allocation62_spill] sm:$0xff] }
 0x65b   :  { %1730 = vmatprep.subr.mxu0 %v3633_v34  ;;  %1801 = vmatprep.subr.mxu1 %v3636_v36 }
 0x65c   :  { %1731 = vmatpush1.msra.mxu0 %v3639_v37  ;;  %1802 = vmatpush1.msra.mxu1 %v3642_v39 }
 0x65d   :  { %1732 = vmatprep.subr.mxu0 %v3645_v19  ;;  %1803 = vmatprep.subr.mxu1 %v3648_v47  ;;  %v4247_v19 = vld [vmem:[#allocation63_spill] sm:$0xff] }
 0x65e   :  { %1733 = vmatpush1.msra.mxu0 %v3651_v48  ;;  %1804 = vmatpush1.msra.mxu1 %v3654_v49  ;;  %v4248_v48 = vld [vmem:[#allocation61_spill] sm:$0xff] }
 0x65f   :  { %1734 = vmatprep.subr.mxu0 %v3657_v50  ;;  %1805 = vmatprep.subr.mxu1 %v3660_v51 }
 0x660   :  { %1735 = vmatpush1.msra.mxu0 %v3663_v52  ;;  %1806 = vmatpush1.msra.mxu1 %v3666_v54 }
 0x661   :  { %1736 = vmatprep.subr.mxu0 %v3669_v55  ;;  %1807 = vmatprep.subr.mxu1 %v3672_v56 }
 0x662   :  { %1737 = vmatpush1.msra.mxu0 %v3675_v57  ;;  %1808 = vmatpush1.msra.mxu1 %v3678_v58 }
 0x663   :  { %1738 = vmatprep.subr.mxu0 %v3681_v59  ;;  %1809 = vmatprep.subr.mxu1 %v3684_v60 }
 0x664   :  { %1739 = vmatpush1.msra.mxu0 %v3687_v61  ;;  %1810 = vmatpush1.msra.mxu1 %v4227_v35  ;;  %v1889_v35 = vld [vmem:[#allocation6 + $0x10] sm:$0xff] }
 0x665   :  { %1740 = vmatprep.subr.mxu0 %v4228_v44  ;;  %1811 = vmatprep.subr.mxu1 %v4229_v8  ;;  %v2109_v44 = vld [vmem:[#allocation9 + $0x78] sm:$0xff]  ;;  %v2108_v8 = vld [vmem:[#allocation9 + $0x70] sm:$0xff] }
 0x666   :  { %1741 = vmatpush1.msra.mxu0 %v4230_v53  ;;  %1812 = vmatpush1.msra.mxu1 %v4231_v11  ;;  %v2107_v53 = vld [vmem:[#allocation9 + $0x68] sm:$0xff]  ;;  %v2106_v11 = vld [vmem:[#allocation9 + $0x60] sm:$0xff] }
 0x667   :  { %1742 = vmatprep.subr.mxu0 %v4232_v9  ;;  %1813 = vmatprep.subr.mxu1 %v4233_v0  ;;  %v2125_v9 = vld [vmem:[#allocation11 + $0x78] sm:$0xff] }
 0x668   :  { %1743 = vmatpush1.msra.mxu0 %v4234_v7  ;;  %1814 = vmatpush1.msra.mxu1 %v4235_v18  ;;  %v2105_v0 = vld [vmem:[#allocation9 + $0x58] sm:$0xff]  ;;  %v2124_v7 = vld [vmem:[#allocation11 + $0x70] sm:$0xff] }
 0x669   :  { %1744 = vmatprep.subr.mxu0 %v4236_v17  ;;  %1815 = vmatprep.subr.mxu1 %v4237_v12  ;;  %v2104_v18 = vld [vmem:[#allocation9 + $0x50] sm:$0xff]  ;;  %v2123_v17 = vld [vmem:[#allocation11 + $0x68] sm:$0xff] }
 0x66a   :  { %1745 = vmatpush1.msra.mxu0 %v4238_v10  ;;  %1816 = vmatpush1.msra.mxu1 %v4239_v26  ;;  %v2103_v12 = vld [vmem:[#allocation9 + $0x48] sm:$0xff]  ;;  %v2122_v10 = vld [vmem:[#allocation11 + $0x60] sm:$0xff] }
 0x66b   :  { %1746 = vmatprep.subr.mxu0 %v4240_v13  ;;  %1817 = vmatprep.subr.mxu1 %v4241_v3  ;;  %v2102_v26 = vld [vmem:[#allocation9 + $0x40] sm:$0xff]  ;;  %v2121_v13 = vld [vmem:[#allocation11 + $0x58] sm:$0xff] }
 0x66c   :  { %1747 = vmatpush1.msra.mxu0 %v4242_v42  ;;  %1780 = vmatprep.mubr.f32.mxu0 %v4243_v43  ;;  %v2101_v3 = vld [vmem:[#allocation9 + $0x38] sm:$0xff]  ;;  %v2120_v42 = vld [vmem:[#allocation11 + $0x50] sm:$0xff] }
 0x66d   :  { %1818 = vmatpush1.msra.mxu1 %v4244_v45  ;;  %1851 = vmatprep.mubr.f32.mxu1 %v4243_v43  ;;  %v2100_v45 = vld [vmem:[#allocation9 + $0x30] sm:$0xff] }
 0x66e   :  { %1952 = vmatprep.subr.mxu0 %v1900_v46  ;;  %2023 = vmatprep.subr.mxu1 %v1902_v16  ;;  %v2119_v46 = vld [vmem:[#allocation11 + $0x48] sm:$0xff] }
 0x66f   :  { %v2099_v16 = vld [vmem:[#allocation9 + $0x28] sm:$0xff] }
 0x70d   :  { %v1608_v15 = vpop.f32.mrf.mxu0  ;;  %v1679_v36 = vpop.f32.mrf.mxu1 }
 0x70e   :  { %v1684_v30 = vadd.f32 %v1608_v15, %v4245_v4  ;;  %v1686_v49 = vadd.f32 %v1679_v36, %v4248_v48  ;;  %v2118_v15 = vld [vmem:[#allocation11 + $0x40] sm:$0xff]  ;;  %v2095_v36 = vld [vmem:[#allocation9 + $0x8] sm:$0xff] }
 0x70f   :  { %v1610_v31 = vpop.f32.mrf.mxu0  ;;  %v1681_v39 = vpop.f32.mrf.mxu1  ;;  %v2098_v4 = vld [vmem:[#allocation9 + $0x20] sm:$0xff]  ;;  %v2111_v48 = vld [vmem:[#allocation11 + $0x8] sm:$0xff] }
 0x710   :  { %v2340_v32 = vmul.f32 -1.442695, %v1684_v30  ;;  %v1685_v34 = vadd.f32 %v1610_v31, %v4246_v33  ;;  %v1687_v47 = vadd.f32 %v1681_v39, %v4247_v19  ;;  %v2117_v30 = vld [vmem:[#allocation11 + $0x38] sm:$0xff]  ;;  %v2096_v33 = vld [vmem:[#allocation9 + $0x10] sm:$0xff]  ;;  %v2094_v39 = vld [vmem:[#allocation9] sm:$0xff] }
 0x711   :  { %v2097_v31 = vld [vmem:[#allocation9 + $0x18] sm:$0xff] }
 0x712   :  { %2564 = vpow2.f32 %v2340_v32  ;;  %v2341_v37 = vmul.f32 -1.442695, %v1685_v34  ;;  %v2342_v50 = vmul.f32 -1.442695, %v1687_v47  ;;  %v2116_v32 = vld [vmem:[#allocation11 + $0x30] sm:$0xff]  ;;  %v2115_v34 = vld [vmem:[#allocation11 + $0x28] sm:$0xff] }
 0x713   :  { %v2113_v19 = vld [vmem:[#allocation11 + $0x18] sm:$0xff]  ;;  %v2112_v47 = vld [vmem:[#allocation11 + $0x10] sm:$0xff] }
 0x714   :  { %2566 = vpow2.f32 %v2341_v37  ;;  %v2114_v37 = vld [vmem:[#allocation11 + $0x20] sm:$0xff] }
 0x715   :  { %2568 = vtanh.f32 %v1686_v49  ;;  %v2110_v49 = vld [vmem:[#allocation11] sm:$0xff] }
 0x716   :  { %2570 = vpow2.f32 %v2342_v50 }
 0x71f   :  { %v2565_v51 = vpop.eup %2564 }
 0x720   :  { %v1691_v52 = vadd.f32 1.0, %v2565_v51  ;;  %v4249_v51 = vld [vmem:[#allocation64_spill] sm:$0xff] }
 0x721   :  { %v2567_v54 = vpop.eup %2566 }
 0x722   :  { %2572 = vrcp.f32 %v1691_v52  ;;  %v1697_v55 = vadd.f32 1.0, %v2567_v54  ;;  %v2569_v56 = vpop.eup %2568 }
 0x723   :  { %v2571_v57 = vpop.eup %2570 }
 0x724   :  { %2574 = vrcp.f32 %v1697_v55  ;;  %v1704_v61 = vadd.f32 1.0, %v2571_v57  ;;  %v1903_v55 = vld [vmem:[%s3967_s4] sm:$0xf]  ;;  %v4250_v57 = vld [vmem:[#allocation66_spill] sm:$0xff] }
 0x726   :  { %2576 = vrcp.f32 %v1704_v61  ;;  %v4251_v61 = vld [vmem:[#allocation40_spill] sm:$0xff] }
 0x72f   :  { %v2573_v58 = vpop.eup %2572 }
 0x730   :  { %v1708_v59 = vmul.f32 %v2573_v58, %v2569_v56 }
 0x731   :  { %v2575_v60 = vpop.eup %2574 }
 0x732   :  { %v1707_v62 = vmul.f32 %v2575_v60, %v3824_v1  ;;  %v1893_v1 = vld [vmem:[#allocation6 + $0x30] sm:$0xff] }
 0x733   :  { %v2577_v25 = vpop.eup %2576 }
 0x734   :  { %v3896_v41 = vadd.f32 %v1708_v59, %v1707_v62  ;;  %v4252_v62 = vsub.s32 0, %v4251_v61 }
 0x736   :  { %2578 = vtanh.f32 %v3896_v41 }
 0x743   :  { %v2579_v38 = vpop.eup %2578 }
 0x744   :  { %v1711_v2 = vmul.f32 %v2579_v38, %v2577_v25  ;;  %v1908_v25 = vrot.slane %v1903_v55, %v4252_v62 }
 0x746   :  { %1781 = vmatmul.mubr.f32.vlgmr.msra.gmra.mxu0 %v1711_v2  ;;  %1852 = vmatmul.mubr.f32.vlgmr.msra.gmra.mxu1 %v1711_v2 }
 0x747   :  { %1953 = vmatpush1.msra.mxu0 %v1899_v24  ;;  %1992 = vmatprep.mubr.f32.mxu0 %v4243_v43 }
 0x748   :  { %1954 = vmatprep.subr.mxu0 %v1896_v20  ;;  %2024 = vmatpush1.msra.mxu1 %v1901_v21 }
 0x749   :  { %1955 = vmatpush1.msra.mxu0 %v1895_v27  ;;  %2025 = vmatprep.subr.mxu1 %v1898_v28 }
 0x74a   :  { %1956 = vmatprep.subr.mxu0 %v1892_v23  ;;  %2026 = vmatpush1.msra.mxu1 %v1897_v5  ;;  %v4254_v23 = vld [vmem:[#allocation67_spill] sm:$0xff] }
 0x74b   :  { %1957 = vmatpush1.msra.mxu0 %v1891_v22  ;;  %2027 = vmatprep.subr.mxu1 %v1894_v6 }
 0x74c   :  { %1958 = vmatprep.subr.mxu0 %v1888_v40  ;;  %2028 = vmatpush1.msra.mxu1 %v1893_v1  ;;  %v4255_v40 = vld [vmem:[#allocation65_spill] sm:$0xff] }
 0x74d   :  { %1959 = vmatpush1.msra.mxu0 %v1887_v63  ;;  %2029 = vmatprep.subr.mxu1 %v1890_v14  ;;  %v4256_v14 = vsub.s32 3, %v4251_v61 }
 0x74e   :  { %2346 = vmatmul.mubr.msk.f32.vlgmr.msra.gmra.mxu0 %vm147_vm0, %v1886_v29  ;;  %2030 = vmatpush1.msra.mxu1 %v1889_v35 }
 0x74f   :  { %2063 = vmatprep.mubr.f32.mxu1 %v4243_v43  ;;  %2421 = vmatprep.subr.mxu1 %v4243_v43 }
 0x750   :  { %2347 = vmatmul.mubr.msk.f32.vlgmr.msra.gmra.mxu1 %vm147_vm0, %v1886_v29  ;;  %2386 = vmatprep.subr.mxu0 %v4243_v43  ;;  %v1920_v29 = vrot.slane %v1903_v55, %v4256_v14 }
 0x751   :  { %2422 = vmatpush3.msra.mxu1 %v2109_v44  ;;  %2387 = vmatpush3.msra.mxu0 %v2125_v9 }
 0x752   :  { %2423 = vmatprep.subr.mxu1 %v4243_v43  ;;  %2388 = vmatprep.subr.mxu0 %v4243_v43 }
 0x753   :  { %2424 = vmatpush3.msra.mxu1 %v2108_v8  ;;  %2389 = vmatpush3.msra.mxu0 %v2124_v7 }
 0x754   :  { %2425 = vmatprep.subr.mxu1 %v4243_v43  ;;  %2390 = vmatprep.subr.mxu0 %v4243_v43 }
 0x755   :  { %2426 = vmatpush3.msra.mxu1 %v2107_v53  ;;  %2391 = vmatpush3.msra.mxu0 %v2123_v17  ;;  %v4257_v53 = vsub.s32 2, %v4251_v61 }
 0x756   :  { %2427 = vmatprep.subr.mxu1 %v4243_v43  ;;  %2392 = vmatprep.subr.mxu0 %v4243_v43 }
 0x757   :  { %2428 = vmatpush3.msra.mxu1 %v2106_v11  ;;  %2393 = vmatpush3.msra.mxu0 %v2122_v10  ;;  %v1916_v11 = vrot.slane %v1903_v55, %v4257_v53 }
 0x758   :  { %2429 = vmatprep.subr.mxu1 %v4243_v43  ;;  %2394 = vmatprep.subr.mxu0 %v4243_v43 }
 0x759   :  { %2430 = vmatpush3.msra.mxu1 %v2105_v0  ;;  %2395 = vmatpush3.msra.mxu0 %v2121_v13 }
 0x75a   :  { %2431 = vmatprep.subr.mxu1 %v4243_v43  ;;  %2396 = vmatprep.subr.mxu0 %v4243_v43 }
 0x75b   :  { %2432 = vmatpush3.msra.mxu1 %v2104_v18  ;;  %2397 = vmatpush3.msra.mxu0 %v2120_v42 }
 0x75c   :  { %2433 = vmatprep.subr.mxu1 %v4243_v43  ;;  %2398 = vmatprep.subr.mxu0 %v4243_v43 }
 0x75d   :  { %2434 = vmatpush3.msra.mxu1 %v2103_v12  ;;  %2399 = vmatpush3.msra.mxu0 %v2119_v46 }
 0x75e   :  { %2435 = vmatprep.subr.mxu1 %v4243_v43  ;;  %2400 = vmatprep.subr.mxu0 %v4243_v43 }
 0x75f   :  { %2436 = vmatpush3.msra.mxu1 %v2102_v26  ;;  %2401 = vmatpush3.msra.mxu0 %v2118_v15 }
 0x760   :  { %2437 = vmatprep.subr.mxu1 %v4243_v43  ;;  %2402 = vmatprep.subr.mxu0 %v4243_v43 }
 0x761   :  { %2438 = vmatpush3.msra.mxu1 %v2101_v3  ;;  %2403 = vmatpush3.msra.mxu0 %v2117_v30 }
 0x762   :  { %2439 = vmatprep.subr.mxu1 %v4243_v43  ;;  %2404 = vmatprep.subr.mxu0 %v4243_v43 }
 0x763   :  { %2440 = vmatpush3.msra.mxu1 %v2100_v45  ;;  %2405 = vmatpush3.msra.mxu0 %v2116_v32 }
 0x764   :  { %2441 = vmatprep.subr.mxu1 %v4243_v43  ;;  %2406 = vmatprep.subr.mxu0 %v4243_v43 }
 0x765   :  { %2442 = vmatpush3.msra.mxu1 %v2099_v16  ;;  %2407 = vmatpush3.msra.mxu0 %v2115_v34 }
 0x766   :  { %2443 = vmatprep.subr.mxu1 %v4243_v43  ;;  %2408 = vmatprep.subr.mxu0 %v4243_v43 }
 0x767   :  { %2444 = vmatpush3.msra.mxu1 %v2098_v4  ;;  %2409 = vmatpush3.msra.mxu0 %v2114_v37 }
 0x768   :  { %2445 = vmatprep.subr.mxu1 %v4243_v43  ;;  %2410 = vmatprep.subr.mxu0 %v4243_v43 }
 0x769   :  { %2446 = vmatpush3.msra.mxu1 %v2097_v31  ;;  %2453 = vmatprep.mubr.msk.f32.mxu1 %vm2818_vm1, %v4243_v43 }
 0x76a   :  { %2447 = vmatprep.subr.mxu1 %v4243_v43  ;;  %2411 = vmatpush3.msra.mxu0 %v2113_v19 }
 0x76b   :  { %2448 = vmatpush3.msra.mxu1 %v2096_v33  ;;  %2412 = vmatprep.subr.mxu0 %v4243_v43 }
 0x76c   :  { %2449 = vmatprep.subr.mxu1 %v4243_v43  ;;  %2418 = vmatprep.mubr.msk.f32.mxu0 %vm2818_vm1, %v4243_v43 }
 0x76d   :  { %2450 = vmatpush3.msra.mxu1 %v2095_v36  ;;  %2413 = vmatpush3.msra.mxu0 %v2112_v47 }
 0x76e   :  { %2451 = vmatprep.subr.mxu1 %v4243_v43  ;;  %2414 = vmatprep.subr.mxu0 %v4243_v43 }
 0x76f   :  { %2452 = vmatpush3.msra.mxu1 %v2094_v39  ;;  %2415 = vmatpush3.msra.mxu0 %v2111_v48 }
 0x770   :  { %2416 = vmatprep.subr.mxu0 %v4243_v43  ;;  %v4253_v43 = vsub.s32 1, %v4251_v61 }
 0x771   :  { %2417 = vmatpush3.msra.mxu0 %v2110_v49 }
 0x772   :  { %v1912_v38 = vrot.slane %v1903_v55, %v4253_v43  ;;  %v4258_v55 = vlaneseq }
 0x806   :  { %v1782_v50 = vpop.f32.mrf.mxu0  ;;  %v1853_v59 = vpop.f32.mrf.mxu1 }
 0x807   :  { %v1858_v52 = vadd.f32 %v1782_v50, %v4249_v51  ;;  %v1860_v1 = vadd.f32 %v1853_v59, %v4255_v40 }
 0x808   :  { %v1784_v54 = vpop.f32.mrf.mxu0  ;;  %v1855_v24 = vpop.f32.mrf.mxu1 }
 0x809   :  { %v2343_v56 = vmul.f32 -1.442695, %v1858_v52  ;;  %v1859_v58 = vadd.f32 %v1784_v54, %v4250_v57  ;;  %v1861_v5 = vadd.f32 %v1855_v24, %v4254_v23 }
 0x80b   :  { %2580 = vpow2.f32 %v2343_v56  ;;  %v2344_v60 = vmul.f32 -1.442695, %v1859_v58  ;;  %v2345_v63 = vmul.f32 -1.442695, %v1861_v5  ;;  %v2275_v56 = vand.u32 127, %v4258_v55 }
 0x80c   :  { %v2351_v58 = vld [vmem:[%s3971_s8] ss:$0 sm:$0xff]  ;;  %s2780_s8 = scalar_lea.vmem %s2296_s11, 128 }
 0x80d   :  { %2582 = vpow2.f32 %v2344_v60  ;;  %vm2276_vm2 = vcmp.lt.s32.totalorder %v2275_v56, 4  ;;  %p2781_p11 = scmp.ne.s32.totalorder %s2296_s11, %s2780_s8  ;;  %p2786_p13 = scmp.lt.s32.totalorder %s2780_s8, %s2780_s8 }
 0x80e   :  { %v1994_v2 = vpop.f32.mrf.mxu0 }
 0x80f   :  { %v1995_v20 = vadd.f32 %v1994_v2, %v1908_v25  ;;  %p2787_p0 = por %p2786_p13, %p2785_p12 }
 0x810   :  { %v1996_v21 = vpop.f32.mrf.mxu0  ;;  %v2065_v6 = vpop.f32.mrf.mxu1 }
 0x811   :  { %v2348_v27 = vmul.f32 -1.442695, %v1995_v20  ;;  %v1997_v28 = vadd.f32 %v1996_v21, %v1912_v38  ;;  %v2066_v18 = vadd.f32 %v2065_v6, %v1916_v11  ;;  %p2788_p1 = pnand %p2787_p0, %p2781_p11 }
 0x812   :  { %v2067_v35 = vpop.f32.mrf.mxu1 }
 0x813   :  { %2584 = vpow2.f32 %v2348_v27  ;;  %v2349_v22 = vmul.f32 -1.442695, %v1997_v28  ;;  %v2068_v0 = vadd.f32 %v2067_v35, %v1920_v29 }
 0x815   :  { %2586 = vpow2.f32 %v2349_v22  ;;  %v2350_v17 = vmul.f32 -1.442695, %v2068_v0 }
 0x816   :  { %2588 = vtanh.f32 %v1860_v1 }
 0x817   :  { %2590 = vpow2.f32 %v2345_v63 }
 0x818   :  { %v2581_v44 = vpop.eup %2580 }
 0x819   :  { %v1865_v8 = vadd.f32 1.0, %v2581_v44 }
 0x81a   :  { %v2583_v9 = vpop.eup %2582 }
 0x81b   :  { %2592 = vrcp.f32 %v1865_v8  ;;  %v1871_v7 = vadd.f32 1.0, %v2583_v9 }
 0x81d   :  { %2594 = vrcp.f32 %v1871_v7 }
 0x81e   :  { %2596 = vtanh.f32 %v2066_v18 }
 0x81f   :  { %2598 = vpow2.f32 %v2350_v17 }
 0x820   :  { %v2585_v12 = vpop.eup %2584 }
 0x821   :  { %v2073_v10 = vadd.f32 1.0, %v2585_v12 }
 0x822   :  { %v2587_v26 = vpop.eup %2586 }
 0x823   :  { %2600 = vrcp.f32 %v2073_v10  ;;  %v2079_v13 = vadd.f32 1.0, %v2587_v26  ;;  %v2589_v3 = vpop.eup %2588 }
 0x824   :  { %v2591_v42 = vpop.eup %2590 }
 0x825   :  { %2602 = vrcp.f32 %v2079_v13  ;;  %v1878_v15 = vadd.f32 1.0, %v2591_v42 }
 0x827   :  { %2604 = vrcp.f32 %v1878_v15 }
 0x828   :  { %v2593_v45 = vpop.eup %2592 }
 0x829   :  { %v1882_v46 = vmul.f32 %v2593_v45, %v2589_v3 }
 0x82a   :  { %v2595_v16 = vpop.eup %2594 }
 0x82b   :  { %v1881_v4 = vmul.f32 %v2595_v16, %v3896_v41  ;;  %v2597_v31 = vpop.eup %2596 }
 0x82c   :  { %v2599_v32 = vpop.eup %2598 }
 0x82d   :  { %v1883_v30 = vadd.f32 %v1882_v46, %v1881_v4  ;;  %v2086_v36 = vadd.f32 1.0, %v2599_v32 }
 0x82f   :  { %2606 = vtanh.f32 %v1883_v30 }
 0x830   :  { %v2601_v33 = vpop.eup %2600  ;;  %2608 = vrcp.f32 %v2086_v36 }
 0x831   :  { %v2090_v39 = vmul.f32 %v2601_v33, %v2597_v31 }
 0x832   :  { %v2603_v34 = vpop.eup %2602 }
 0x833   :  { %v2089_v37 = vmul.f32 0.0, %v2603_v34 }
 0x834   :  { %v2605_v47 = vpop.eup %2604 }
 0x835   :  { %v2091_v19 = vadd.f32 %v2090_v39, %v2089_v37 }
 0x837   :  { %2610 = vtanh.f32 %v2091_v19 }
 0x83c   :  { %v2607_v48 = vpop.eup %2606 }
 0x83d   :  { %v1885_v49 = vmul.f32 %v2607_v48, %v2605_v47  ;;  %v2609_v50 = vpop.eup %2608 }
 0x83f   :  { %2454 = vmatmul.mubr.f32.vlgmr.msra.gmra.mxu1 %v1885_v49 }
 0x844   :  { %v2611_v51 = vpop.eup %2610 }
 0x845   :  { %v2093_v41 = vmul.f32 %v2611_v51, %v2609_v50 }
 0x847   :  { %2419 = vmatmul.mubr.f32.vlgmr.msra.gmra.mxu0 %v2093_v41 }
 0x8ff   :  { %v2262_v52 = vpop.f32.mrf.mxu1 }
 0x901   :  { %v2455_v54 = vpop.f32.mrf.mxu1 }
 0x907   :  { %v2192_v57 = vpop.f32.mrf.mxu0 }
 0x908   :  { %v2263_v59 = vadd.f32 %v2262_v52, %v2192_v57 }
 0x909   :  { %v2420_v60 = vpop.f32.mrf.mxu0 }
 0x90a   :  { %v2273_v61 = vadd.f32 %v2351_v58, %v2263_v59 }
 0x90c   :  { %v2277_v62 = vsel %vm2276_vm2, %v2273_v61, -1e+30 }
 0x90d   :  { %2278 = vmax.xlane.f32.xlu0 %v2277_v62 }
 0x996   :  { %v2279_v25 = vpop.xlane.xlu0 %2278 }
 0x997   :  { %v2280_v43 = vsub.f32 %v2277_v62, %v2279_v25 }
 0x999   :  { %v2281_v38 = vmul.f32 1.442695, %v2280_v43 }
 0x99b   :  { %2612 = vpow2.f32 %v2281_v38 }
 0x9a8   :  { %v2613_v2 = vpop.eup %2612 }
 0x9a9   :  { %2283 = vadd.xlane.f32.xlu0 %v2613_v2 }
 0xa32   :  { %v2284_v24 = vpop.xlane.xlu0 %2283 }
 0xa33   :  { %2614 = vlog2.f32 %v2284_v24 }
 0xa40   :  { %v2615_v20 = vpop.eup %2614 }
 0xa41   :  { %v2286_v21 = vmul.f32 0.6931472, %v2615_v20 }
 0xa43   :  { %v2287_v27 = vsub.f32 %v2280_v43, %v2286_v21 }
 0xa45   :  { %2288 = vst [vmem:[#allocation12] sm:$0xff] %v2287_v27 }
 0xa46   :  { %2791 = shalt.err (!%p2788_p1)
}
 0xa47   :  { %2298 = dma.vmem_to_hbm [thread:$0]  %s2296_s11, 128, %s3972_s9, [#allocation5]  }
 0xa48   :  { %2806 = dma.done.wait [#allocation5], 128  }
 0xa49   :  { %2807 = vsyncadd [#allocation5], 4294967168 }
 0xa4a   :  { %2302 = vsyncpa [#allocation4], 1 }
 0xa4b   :  { %2303 = vsyncpa [#allocation7], 1 }
 0xa4c   :  { %2304 = vsyncpa [#allocation10], 1 }
 0xa4d   :  { %2305 = vsyncpa [#allocation5], 1 }

</bundles_post_ra>
